<compile_context>
chip_gen: v6e
topology: v6e:2x2x1
jax: 0.10.0
libtpu: 0.0.40
codegen_flags: <defaults>
</compile_context>

<pallas_src>
import functools

import jax
import jax.numpy as jnp
from jax.experimental import pallas as pl
from jax.experimental.pallas import tpu as pltpu

_VMEM_LIMIT_BYTES = 64 * 1024 * 1024


# --------------------------- kernels ---------------------------
def _conv_stats_kernel(x_ref, w_ref, s_ref, b_ref, y_ref, stats_ref, *,
                       H, W, Cin, Cout, fuse_input_affine, pad_output):
    """3x3 'SAME' conv on one image + per-image BN partial statistics.

    x_ref     : (H+2, W+2, Cin)   spatially padded input (bf16; f32 raw conv1
                output when fuse_input_affine=True)
    w_ref     : (9, Cin, Cout)    bf16 taps, row-major (ky, kx)
    s_ref/b_ref: (1, Cin)         folded BN scale/shift applied to the *input*
                (only read when fuse_input_affine=True)
    y_ref     : (H+2, W+2, Cout) if pad_output else (H, W, Cout); raw conv output
    stats_ref : (2, Cout)         [per-image mean, per-image sum((x-mean)^2)]
    """
    Hp, Wp = H + 2, W + 2
    xin = x_ref[...]
    if fuse_input_affine:
        # Previous block's BN+ReLU fused into the load. The 1-px halo must stay
        # exactly zero (it represents the conv's zero padding), so mask it.
        xf = xin.astype(jnp.float32) * s_ref[...] + b_ref[...]
        row = jax.lax.broadcasted_iota(jnp.int32, (Hp, Wp, Cin), 0)
        col = jax.lax.broadcasted_iota(jnp.int32, (Hp, Wp, Cin), 1)
        interior = (row >= 1) & (row <= H) & (col >= 1) & (col <= W)
        x = jnp.where(interior, jnp.maximum(xf, 0.0), 0.0).astype(jnp.bfloat16)
    else:
        x = xin.astype(jnp.bfloat16)          # input already bf16 -> no-op

    hw = H * W
    acc = jnp.zeros((hw, Cout), jnp.float32)
    # 9 accumulated per-tap dots (no materialized im2col). Only one sublane-
    # shifted slice per kx; the ky shift is a free major-dim slice.
    # TODO(synk): at Cin>=128 pair two taps per dot (K=256) for full MXU depth
    # on v6e/v7x.
    for kx in range(3):
        xs = x[:, kx:kx + W, :]                        # (Hp, W, Cin)
        for ky in range(3):
            win = xs[ky:ky + H].reshape(hw, Cin)       # contiguous when W % 8 == 0
            acc = acc + jnp.dot(win, w_ref[ky * 3 + kx],
                                preferred_element_type=jnp.float32)

    # Per-image BN partials, two-pass (mean then M2) -> no catastrophic
    # cancellation; combined across the batch in the wrapper (Chan).
    mean = jnp.sum(acc, axis=0, keepdims=True) * (1.0 / hw)
    d = acc - mean
    m2 = jnp.sum(d * d, axis=0, keepdims=True)
    stats_ref[...] = jnp.concatenate([mean, m2], axis=0)

    yo = acc.reshape(H, W, Cout).astype(y_ref.dtype)
    if pad_output:
        # Emit already spatially padded for the next conv; zero only the 1-px
        # halo frame, never the whole buffer.
        zr = jnp.zeros((1, Wp, Cout), y_ref.dtype)
        zc = jnp.zeros((H, 1, Cout), y_ref.dtype)
        y_ref[0:1, :, :] = zr
        y_ref[H + 1:H + 2, :, :] = zr
        y_ref[1:H + 1, 0:1, :] = zc
        y_ref[1:H + 1, W + 1:W + 2, :] = zc
        y_ref[1:H + 1, 1:W + 1, :] = yo
    else:
        y_ref[...] = yo


def _affine_relu_kernel(y_ref, s_ref, b_ref, o_ref):
    """Final BN (folded to per-channel FMA) + ReLU."""
    y = y_ref[...].astype(jnp.float32)
    o_ref[...] = jnp.maximum(y * s_ref[...] + b_ref[...], 0.0).astype(o_ref.dtype)


# --------------------------- pallas_call wrappers ---------------------------
def _conv_call(xp, w, scale, shift, *, H, W, fuse_input_affine, pad_output):
    N = xp.shape[0]
    Cin, Cout = w.shape[1], w.shape[2]
    Hp, Wp = H + 2, W + 2
    y_shape = (N, Hp, Wp, Cout) if pad_output else (N, H, W, Cout)

    kernel = functools.partial(
        _conv_stats_kernel, H=H, W=W, Cin=Cin, Cout=Cout,
        fuse_input_affine=fuse_input_affine, pad_output=pad_output)

    return pl.pallas_call(
        kernel,
        grid=(N,),
        in_specs=[
            pl.BlockSpec((None, Hp, Wp, Cin), lambda n: (n, 0, 0, 0)),
            pl.BlockSpec((9, Cin, Cout), lambda n: (0, 0, 0)),
            pl.BlockSpec((1, Cin), lambda n: (0, 0)),
            pl.BlockSpec((1, Cin), lambda n: (0, 0)),
        ],
        out_specs=(
            pl.BlockSpec((None,) + y_shape[1:], lambda n: (n, 0, 0, 0)),
            pl.BlockSpec((None, 2, Cout), lambda n: (n, 0, 0)),
        ),
        out_shape=(
            jax.ShapeDtypeStruct(y_shape, jnp.float32),
            jax.ShapeDtypeStruct((N, 2, Cout), jnp.float32),
        ),
        compiler_params=pltpu.CompilerParams(
            dimension_semantics=("parallel",),
            vmem_limit_bytes=_VMEM_LIMIT_BYTES),
    )(xp, w, scale, shift)


def _affine_relu_call(y, scale, shift):
    N, H, W, C = y.shape
    th = 8 if H % 8 == 0 else H
    return pl.pallas_call(
        _affine_relu_kernel,
        grid=(N, H // th),
        in_specs=[
            pl.BlockSpec((None, th, W, C), lambda n, h: (n, h, 0, 0)),
            pl.BlockSpec((1, C), lambda n, h: (0, 0)),
            pl.BlockSpec((1, C), lambda n, h: (0, 0)),
        ],
        out_specs=pl.BlockSpec((None, th, W, C), lambda n, h: (n, h, 0, 0)),
        out_shape=jax.ShapeDtypeStruct((N, H, W, C), jnp.float32),
        compiler_params=pltpu.CompilerParams(
            dimension_semantics=("parallel", "parallel"),
            vmem_limit_bytes=_VMEM_LIMIT_BYTES),
    )(y, scale, shift)


def _bn_fold(stats, gamma, beta, per_image_count, eps):
    """Combine per-image (mean, M2) partials (Chan) and fold BN into scale/shift."""
    mean_i = stats[:, 0, :]                          # (N, C)
    m2_i = stats[:, 1, :]                            # (N, C)
    n_img = stats.shape[0]
    mean = jnp.mean(mean_i, axis=0)
    m2 = jnp.sum(m2_i, axis=0) + per_image_count * jnp.sum((mean_i - mean) ** 2, axis=0)
    var = m2 / (n_img * per_image_count)             # biased var, training-mode BN
    scale = gamma.astype(jnp.float32) * jax.lax.rsqrt(var + eps)
    shift = beta.astype(jnp.float32) - mean * scale
    return scale.reshape(1, -1), shift.reshape(1, -1)


def double_conv(x_nchw, params, eps=1e-5):
    """DoubleConv forward. NCHW in (PyTorch convention), NCHW out."""
    N, Cin, H, W = x_nchw.shape
    w1, w2 = params["w1"], params["w2"]              # HWIO
    Cmid, Cout = w1.shape[-1], w2.shape[-1]

    # NCHW -> NHWC, bf16 (halves input DMA; the MXU consumes bf16 anyway),
    # 1-pixel spatial halo. Channels are NOT padded in HBM.
    x = jnp.transpose(x_nchw, (0, 2, 3, 1)).astype(jnp.bfloat16)
    x = jnp.pad(x, ((0, 0), (1, 1), (1, 1), (0, 0)))

    w1r = w1.reshape(9, Cin, Cmid).astype(jnp.bfloat16)
    w2r = w2.reshape(9, Cmid, Cout).astype(jnp.bfloat16)

    one = jnp.ones((1, Cin), jnp.float32)
    zero = jnp.zeros((1, Cin), jnp.float32)

    # Block 1: conv1 + per-image BN1 partials (output spatially pre-padded).
    y1p, st1 = _conv_call(x, w1r, one, zero, H=H, W=W,
                          fuse_input_affine=False, pad_output=True)
    s1, t1 = _bn_fold(st1, params["g1"], params["b1"], H * W, eps)

    # Block 2: BN1+ReLU fused into conv2's input read; conv2 + BN2 partials.
    y2, st2 = _conv_call(y1p, w2r, s1, t1, H=H, W=W,
                         fuse_input_affine=True, pad_output=False)
    s2, t2 = _bn_fold(st2, params["g2"], params["b2"], H * W, eps)

    # BN2 + ReLU (global stats needed, so a separate elementwise pass).
    out = _affine_relu_call(y2, s2, t2)               # (N, H, W, Cout) f32
    return jnp.transpose(out, (0, 3, 1, 2))           # NHWC -> NCHW


# --------------------------- reference (plain JAX) ---------------------------
def _ref_block(x_nhwc, w_hwio, gamma, beta, eps=1e-5):
    # Same precision regime as the kernel: bf16 matmul, f32 accumulation & BN.
    y = jax.lax.conv_general_dilated(
        x_nhwc.astype(jnp.bfloat16), w_hwio.astype(jnp.bfloat16),
        window_strides=(1, 1), padding="SAME",
        dimension_numbers=("NHWC", "HWIO", "NHWC"),
        preferred_element_type=jnp.float32)
    mean = jnp.mean(y, axis=(0, 1, 2), keepdims=True)
    var = jnp.mean((y - mean) ** 2, axis=(0, 1, 2), keepdims=True)
    y = (y - mean) * jax.lax.rsqrt(var + eps) * gamma + beta
    return jnp.maximum(y, 0.0)


def double_conv_ref(x_nchw, params):
    x = jnp.transpose(x_nchw, (0, 2, 3, 1)).astype(jnp.float32)
    h = _ref_block(x, params["w1"], params["g1"], params["b1"])
    h = _ref_block(h, params["w2"], params["g2"], params["b2"])
    return jnp.transpose(h, (0, 3, 1, 2))


if __name__ == "__main__":
    key = jax.random.PRNGKey(0)
    k_x, k_w1, k_w2, k_g1, k_g2 = jax.random.split(key, 5)

    N, Cin, H, W = 2, 4, 16, 16
    Cout = 8

    # PyTorch-convention NCHW input.
    x = jax.random.normal(k_x, (N, Cin, H, W), dtype=jnp.float32)

    # Deterministic synthetic parameters. PyTorch Conv2d weights are OIHW
    # (Cout, Cin, 3, 3); build that way then transpose to HWIO for NHWC conv.
    w1_oihw = 0.1 * jax.random.normal(k_w1, (Cout, Cin, 3, 3), dtype=jnp.float32)
    w2_oihw = 0.1 * jax.random.normal(k_w2, (Cout, Cout, 3, 3), dtype=jnp.float32)
    params = {
        "w1": jnp.transpose(w1_oihw, (2, 3, 1, 0)),   # HWIO
        "w2": jnp.transpose(w2_oihw, (2, 3, 1, 0)),   # HWIO
        "g1": 1.0 + 0.1 * jax.random.normal(k_g1, (Cout,), dtype=jnp.float32),
        "b1": 0.05 * jnp.arange(Cout, dtype=jnp.float32),
        "g2": 1.0 + 0.1 * jax.random.normal(k_g2, (Cout,), dtype=jnp.float32),
        "b2": 0.02 * jnp.arange(Cout, dtype=jnp.float32),
    }

    out = jax.block_until_ready(double_conv(x, params))
    ref = jax.block_until_ready(double_conv_ref(x, params))

    assert out.shape == (N, Cout, H, W), out.shape
    max_err = float(jnp.max(jnp.abs(out - ref)))
    assert jnp.allclose(out, ref, rtol=1e-2, atol=1e-2), max_err

    print("KERNEL_OK")
</pallas_src>

<mosaic_0001>
module attributes {stable_mosaic.version = 11 : i64} {
  func.func @_conv_stats_kernel(%arg0: i32, %arg1: memref<1x18x18x4xbf16, #tpu.memory_space<vmem>>, %arg2: memref<9x4x8xbf16, #tpu.memory_space<vmem>>, %arg3: memref<1x4xf32, #tpu.memory_space<vmem>>, %arg4: memref<1x4xf32, #tpu.memory_space<vmem>>, %arg5: memref<1x18x18x8xf32, #tpu.memory_space<vmem>>, %arg6: memref<1x2x8xf32, #tpu.memory_space<vmem>>) attributes {dimension_semantics = [#tpu.dimension_semantics<parallel>], iteration_bounds = array<i64: 2>, scalar_prefetch = 0 : i64, scratch_operands = 0 : i64, tpu.core_type = #tpu.core_type<tc>, window_params = [{transform_indices = @transform_0, window_bounds = array<i64: 1, 18, 18, 4>}, {pipeline_mode = #tpu.pipeline_mode<synchronous>, transform_indices = @transform_1, window_bounds = array<i64: 9, 4, 8>}, {pipeline_mode = #tpu.pipeline_mode<synchronous>, transform_indices = @transform_2, window_bounds = array<i64: 1, 4>}, {pipeline_mode = #tpu.pipeline_mode<synchronous>, transform_indices = @transform_3, window_bounds = array<i64: 1, 4>}, {transform_indices = @transform_4, window_bounds = array<i64: 1, 18, 18, 8>}, {transform_indices = @transform_5, window_bounds = array<i64: 1, 2, 8>}]} {
    %c0 = arith.constant 0 : index
    %c0_0 = arith.constant 0 : index
    %c0_1 = arith.constant 0 : index
    %c0_2 = arith.constant 0 : index
    %0 = vector.load %arg1[%c0, %c0_0, %c0_1, %c0_2] : memref<1x18x18x4xbf16, #tpu.memory_space<vmem>>, vector<1x18x18x4xbf16>
    %1 = vector.shape_cast %0 : vector<1x18x18x4xbf16> to vector<18x18x4xbf16>
    %cst = arith.constant 0.000000e+00 : f32
    %2 = vector.broadcast %cst : f32 to vector<256x8xf32>
    %3 = vector.extract_strided_slice %1 {offsets = [0, 0, 0], sizes = [18, 16, 4], strides = [1, 1, 1]} : vector<18x18x4xbf16> to vector<18x16x4xbf16>
    %4 = vector.extract_strided_slice %3 {offsets = [0, 0, 0], sizes = [16, 16, 4], strides = [1, 1, 1]} : vector<18x16x4xbf16> to vector<16x16x4xbf16>
    %5 = vector.shape_cast %4 : vector<16x16x4xbf16> to vector<256x4xbf16>
    %c0_3 = arith.constant 0 : index
    %c0_4 = arith.constant 0 : index
    %c0_5 = arith.constant 0 : index
    %6 = vector.load %arg2[%c0_3, %c0_4, %c0_5] : memref<9x4x8xbf16, #tpu.memory_space<vmem>>, vector<1x4x8xbf16>
    %7 = vector.shape_cast %6 : vector<1x4x8xbf16> to vector<4x8xbf16>
    %cst_6 = arith.constant dense<0.000000e+00> : vector<256x8xf32>
    %8 = tpu.matmul %5, %7, %cst_6 {dimension_numbers = #tpu.dot_dimension_numbers<[1], [0], [0], [1], [0, 0, 1, 1], [], []>} : vector<256x4xbf16>, vector<4x8xbf16>, vector<256x8xf32> -> vector<256x8xf32>
    %9 = arith.addf %2, %8 : vector<256x8xf32>
    %10 = vector.extract_strided_slice %3 {offsets = [1, 0, 0], sizes = [16, 16, 4], strides = [1, 1, 1]} : vector<18x16x4xbf16> to vector<16x16x4xbf16>
    %11 = vector.shape_cast %10 : vector<16x16x4xbf16> to vector<256x4xbf16>
    %c3 = arith.constant 3 : index
    %c0_7 = arith.constant 0 : index
    %c0_8 = arith.constant 0 : index
    %12 = vector.load %arg2[%c3, %c0_7, %c0_8] : memref<9x4x8xbf16, #tpu.memory_space<vmem>>, vector<1x4x8xbf16>
    %13 = vector.shape_cast %12 : vector<1x4x8xbf16> to vector<4x8xbf16>
    %cst_9 = arith.constant dense<0.000000e+00> : vector<256x8xf32>
    %14 = tpu.matmul %11, %13, %cst_9 {dimension_numbers = #tpu.dot_dimension_numbers<[1], [0], [0], [1], [0, 0, 1, 1], [], []>} : vector<256x4xbf16>, vector<4x8xbf16>, vector<256x8xf32> -> vector<256x8xf32>
    %15 = arith.addf %9, %14 : vector<256x8xf32>
    %16 = vector.extract_strided_slice %3 {offsets = [2, 0, 0], sizes = [16, 16, 4], strides = [1, 1, 1]} : vector<18x16x4xbf16> to vector<16x16x4xbf16>
    %17 = vector.shape_cast %16 : vector<16x16x4xbf16> to vector<256x4xbf16>
    %c6 = arith.constant 6 : index
    %c0_10 = arith.constant 0 : index
    %c0_11 = arith.constant 0 : index
    %18 = vector.load %arg2[%c6, %c0_10, %c0_11] : memref<9x4x8xbf16, #tpu.memory_space<vmem>>, vector<1x4x8xbf16>
    %19 = vector.shape_cast %18 : vector<1x4x8xbf16> to vector<4x8xbf16>
    %cst_12 = arith.constant dense<0.000000e+00> : vector<256x8xf32>
    %20 = tpu.matmul %17, %19, %cst_12 {dimension_numbers = #tpu.dot_dimension_numbers<[1], [0], [0], [1], [0, 0, 1, 1], [], []>} : vector<256x4xbf16>, vector<4x8xbf16>, vector<256x8xf32> -> vector<256x8xf32>
    %21 = arith.addf %15, %20 : vector<256x8xf32>
    %22 = vector.extract_strided_slice %1 {offsets = [0, 1, 0], sizes = [18, 16, 4], strides = [1, 1, 1]} : vector<18x18x4xbf16> to vector<18x16x4xbf16>
    %23 = vector.extract_strided_slice %22 {offsets = [0, 0, 0], sizes = [16, 16, 4], strides = [1, 1, 1]} : vector<18x16x4xbf16> to vector<16x16x4xbf16>
    %24 = vector.shape_cast %23 : vector<16x16x4xbf16> to vector<256x4xbf16>
    %c1 = arith.constant 1 : index
    %c0_13 = arith.constant 0 : index
    %c0_14 = arith.constant 0 : index
    %25 = vector.load %arg2[%c1, %c0_13, %c0_14] : memref<9x4x8xbf16, #tpu.memory_space<vmem>>, vector<1x4x8xbf16>
    %26 = vector.shape_cast %25 : vector<1x4x8xbf16> to vector<4x8xbf16>
    %cst_15 = arith.constant dense<0.000000e+00> : vector<256x8xf32>
    %27 = tpu.matmul %24, %26, %cst_15 {dimension_numbers = #tpu.dot_dimension_numbers<[1], [0], [0], [1], [0, 0, 1, 1], [], []>} : vector<256x4xbf16>, vector<4x8xbf16>, vector<256x8xf32> -> vector<256x8xf32>
    %28 = arith.addf %21, %27 : vector<256x8xf32>
    %29 = vector.extract_strided_slice %22 {offsets = [1, 0, 0], sizes = [16, 16, 4], strides = [1, 1, 1]} : vector<18x16x4xbf16> to vector<16x16x4xbf16>
    %30 = vector.shape_cast %29 : vector<16x16x4xbf16> to vector<256x4xbf16>
    %c4 = arith.constant 4 : index
    %c0_16 = arith.constant 0 : index
    %c0_17 = arith.constant 0 : index
    %31 = vector.load %arg2[%c4, %c0_16, %c0_17] : memref<9x4x8xbf16, #tpu.memory_space<vmem>>, vector<1x4x8xbf16>
    %32 = vector.shape_cast %31 : vector<1x4x8xbf16> to vector<4x8xbf16>
    %cst_18 = arith.constant dense<0.000000e+00> : vector<256x8xf32>
    %33 = tpu.matmul %30, %32, %cst_18 {dimension_numbers = #tpu.dot_dimension_numbers<[1], [0], [0], [1], [0, 0, 1, 1], [], []>} : vector<256x4xbf16>, vector<4x8xbf16>, vector<256x8xf32> -> vector<256x8xf32>
    %34 = arith.addf %28, %33 : vector<256x8xf32>
    %35 = vector.extract_strided_slice %22 {offsets = [2, 0, 0], sizes = [16, 16, 4], strides = [1, 1, 1]} : vector<18x16x4xbf16> to vector<16x16x4xbf16>
    %36 = vector.shape_cast %35 : vector<16x16x4xbf16> to vector<256x4xbf16>
    %c7 = arith.constant 7 : index
    %c0_19 = arith.constant 0 : index
    %c0_20 = arith.constant 0 : index
    %37 = vector.load %arg2[%c7, %c0_19, %c0_20] : memref<9x4x8xbf16, #tpu.memory_space<vmem>>, vector<1x4x8xbf16>
    %38 = vector.shape_cast %37 : vector<1x4x8xbf16> to vector<4x8xbf16>
    %cst_21 = arith.constant dense<0.000000e+00> : vector<256x8xf32>
    %39 = tpu.matmul %36, %38, %cst_21 {dimension_numbers = #tpu.dot_dimension_numbers<[1], [0], [0], [1], [0, 0, 1, 1], [], []>} : vector<256x4xbf16>, vector<4x8xbf16>, vector<256x8xf32> -> vector<256x8xf32>
    %40 = arith.addf %34, %39 : vector<256x8xf32>
    %41 = vector.extract_strided_slice %1 {offsets = [0, 2, 0], sizes = [18, 16, 4], strides = [1, 1, 1]} : vector<18x18x4xbf16> to vector<18x16x4xbf16>
    %42 = vector.extract_strided_slice %41 {offsets = [0, 0, 0], sizes = [16, 16, 4], strides = [1, 1, 1]} : vector<18x16x4xbf16> to vector<16x16x4xbf16>
    %43 = vector.shape_cast %42 : vector<16x16x4xbf16> to vector<256x4xbf16>
    %c2 = arith.constant 2 : index
    %c0_22 = arith.constant 0 : index
    %c0_23 = arith.constant 0 : index
    %44 = vector.load %arg2[%c2, %c0_22, %c0_23] : memref<9x4x8xbf16, #tpu.memory_space<vmem>>, vector<1x4x8xbf16>
    %45 = vector.shape_cast %44 : vector<1x4x8xbf16> to vector<4x8xbf16>
    %cst_24 = arith.constant dense<0.000000e+00> : vector<256x8xf32>
    %46 = tpu.matmul %43, %45, %cst_24 {dimension_numbers = #tpu.dot_dimension_numbers<[1], [0], [0], [1], [0, 0, 1, 1], [], []>} : vector<256x4xbf16>, vector<4x8xbf16>, vector<256x8xf32> -> vector<256x8xf32>
    %47 = arith.addf %40, %46 : vector<256x8xf32>
    %48 = vector.extract_strided_slice %41 {offsets = [1, 0, 0], sizes = [16, 16, 4], strides = [1, 1, 1]} : vector<18x16x4xbf16> to vector<16x16x4xbf16>
    %49 = vector.shape_cast %48 : vector<16x16x4xbf16> to vector<256x4xbf16>
    %c5 = arith.constant 5 : index
    %c0_25 = arith.constant 0 : index
    %c0_26 = arith.constant 0 : index
    %50 = vector.load %arg2[%c5, %c0_25, %c0_26] : memref<9x4x8xbf16, #tpu.memory_space<vmem>>, vector<1x4x8xbf16>
    %51 = vector.shape_cast %50 : vector<1x4x8xbf16> to vector<4x8xbf16>
    %cst_27 = arith.constant dense<0.000000e+00> : vector<256x8xf32>
    %52 = tpu.matmul %49, %51, %cst_27 {dimension_numbers = #tpu.dot_dimension_numbers<[1], [0], [0], [1], [0, 0, 1, 1], [], []>} : vector<256x4xbf16>, vector<4x8xbf16>, vector<256x8xf32> -> vector<256x8xf32>
    %53 = arith.addf %47, %52 : vector<256x8xf32>
    %54 = vector.extract_strided_slice %41 {offsets = [2, 0, 0], sizes = [16, 16, 4], strides = [1, 1, 1]} : vector<18x16x4xbf16> to vector<16x16x4xbf16>
    %55 = vector.shape_cast %54 : vector<16x16x4xbf16> to vector<256x4xbf16>
    %c8 = arith.constant 8 : index
    %c0_28 = arith.constant 0 : index
    %c0_29 = arith.constant 0 : index
    %56 = vector.load %arg2[%c8, %c0_28, %c0_29] : memref<9x4x8xbf16, #tpu.memory_space<vmem>>, vector<1x4x8xbf16>
    %57 = vector.shape_cast %56 : vector<1x4x8xbf16> to vector<4x8xbf16>
    %cst_30 = arith.constant dense<0.000000e+00> : vector<256x8xf32>
    %58 = tpu.matmul %55, %57, %cst_30 {dimension_numbers = #tpu.dot_dimension_numbers<[1], [0], [0], [1], [0, 0, 1, 1], [], []>} : vector<256x4xbf16>, vector<4x8xbf16>, vector<256x8xf32> -> vector<256x8xf32>
    %59 = arith.addf %53, %58 : vector<256x8xf32>
    %cst_31 = arith.constant dense<0.000000e+00> : vector<8xf32>
    %60 = vector.multi_reduction <add>, %59, %cst_31 [0] : vector<256x8xf32> to vector<8xf32>
    %61 = vector.shape_cast %60 : vector<8xf32> to vector<1x8xf32>
    %cst_32 = arith.constant 3.906250e-03 : f32
    %62 = vector.broadcast %cst_32 : f32 to vector<1x8xf32>
    %63 = arith.mulf %61, %62 : vector<1x8xf32>
    %64 = vector.broadcast %63 : vector<1x8xf32> to vector<256x8xf32>
    %65 = arith.subf %59, %64 : vector<256x8xf32>
    %66 = arith.mulf %65, %65 : vector<256x8xf32>
    %cst_33 = arith.constant dense<0.000000e+00> : vector<8xf32>
    %67 = vector.multi_reduction <add>, %66, %cst_33 [0] : vector<256x8xf32> to vector<8xf32>
    %68 = vector.shape_cast %67 : vector<8xf32> to vector<1x8xf32>
    %69 = tpu.concatenate %63, %68 in 0 : vector<1x8xf32>, vector<1x8xf32> -> vector<2x8xf32>
    %c0_34 = arith.constant 0 : index
    %c0_35 = arith.constant 0 : index
    %c0_36 = arith.constant 0 : index
    %70 = vector.load %arg6[%c0_34, %c0_35, %c0_36] : memref<1x2x8xf32, #tpu.memory_space<vmem>>, vector<1x2x8xf32>
    %71 = vector.shape_cast %70 : vector<1x2x8xf32> to vector<2x8xf32>
    %72 = vector.shape_cast %69 : vector<2x8xf32> to vector<1x2x8xf32>
    tpu.vector_store %arg6[%c0_34, %c0_35, %c0_36], %72 {strides = array<i32>} : memref<1x2x8xf32, #tpu.memory_space<vmem>>, vector<1x2x8xf32>,
    %73 = vector.shape_cast %59 : vector<256x8xf32> to vector<16x16x8xf32>
    %cst_37 = arith.constant 0.000000e+00 : f32
    %74 = vector.broadcast %cst_37 : f32 to vector<1x18x8xf32>
    %cst_38 = arith.constant 0.000000e+00 : f32
    %75 = vector.broadcast %cst_38 : f32 to vector<16x1x8xf32>
    %c0_39 = arith.constant 0 : index
    %c0_40 = arith.constant 0 : index
    %c0_41 = arith.constant 0 : index
    %c0_42 = arith.constant 0 : index
    %76 = vector.load %arg5[%c0_39, %c0_40, %c0_41, %c0_42] : memref<1x18x18x8xf32, #tpu.memory_space<vmem>>, vector<1x1x18x8xf32>
    %77 = vector.shape_cast %76 : vector<1x1x18x8xf32> to vector<1x18x8xf32>
    %78 = vector.shape_cast %74 : vector<1x18x8xf32> to vector<1x1x18x8xf32>
    tpu.vector_store %arg5[%c0_39, %c0_40, %c0_41, %c0_42], %78 {strides = array<i32>} : memref<1x18x18x8xf32, #tpu.memory_space<vmem>>, vector<1x1x18x8xf32>,
    %c0_43 = arith.constant 0 : index
    %c17 = arith.constant 17 : index
    %c0_44 = arith.constant 0 : index
    %c0_45 = arith.constant 0 : index
    %79 = vector.load %arg5[%c0_43, %c17, %c0_44, %c0_45] : memref<1x18x18x8xf32, #tpu.memory_space<vmem>>, vector<1x1x18x8xf32>
    %80 = vector.shape_cast %79 : vector<1x1x18x8xf32> to vector<1x18x8xf32>
    %81 = vector.shape_cast %74 : vector<1x18x8xf32> to vector<1x1x18x8xf32>
    tpu.vector_store %arg5[%c0_43, %c17, %c0_44, %c0_45], %81 {strides = array<i32>} : memref<1x18x18x8xf32, #tpu.memory_space<vmem>>, vector<1x1x18x8xf32>,
    %c0_46 = arith.constant 0 : index
    %c1_47 = arith.constant 1 : index
    %c0_48 = arith.constant 0 : index
    %c0_49 = arith.constant 0 : index
    %82 = vector.load %arg5[%c0_46, %c1_47, %c0_48, %c0_49] : memref<1x18x18x8xf32, #tpu.memory_space<vmem>>, vector<1x16x1x8xf32>
    %83 = vector.shape_cast %82 : vector<1x16x1x8xf32> to vector<16x1x8xf32>
    %84 = vector.shape_cast %75 : vector<16x1x8xf32> to vector<1x16x1x8xf32>
    tpu.vector_store %arg5[%c0_46, %c1_47, %c0_48, %c0_49], %84 {strides = array<i32>} : memref<1x18x18x8xf32, #tpu.memory_space<vmem>>, vector<1x16x1x8xf32>,
    %c0_50 = arith.constant 0 : index
    %c1_51 = arith.constant 1 : index
    %c17_52 = arith.constant 17 : index
    %c0_53 = arith.constant 0 : index
    %85 = vector.load %arg5[%c0_50, %c1_51, %c17_52, %c0_53] : memref<1x18x18x8xf32, #tpu.memory_space<vmem>>, vector<1x16x1x8xf32>
    %86 = vector.shape_cast %85 : vector<1x16x1x8xf32> to vector<16x1x8xf32>
    %87 = vector.shape_cast %75 : vector<16x1x8xf32> to vector<1x16x1x8xf32>
    tpu.vector_store %arg5[%c0_50, %c1_51, %c17_52, %c0_53], %87 {strides = array<i32>} : memref<1x18x18x8xf32, #tpu.memory_space<vmem>>, vector<1x16x1x8xf32>,
    %c0_54 = arith.constant 0 : index
    %c1_55 = arith.constant 1 : index
    %c1_56 = arith.constant 1 : index
    %c0_57 = arith.constant 0 : index
    %88 = vector.load %arg5[%c0_54, %c1_55, %c1_56, %c0_57] : memref<1x18x18x8xf32, #tpu.memory_space<vmem>>, vector<1x16x16x8xf32>
    %89 = vector.shape_cast %88 : vector<1x16x16x8xf32> to vector<16x16x8xf32>
    %90 = vector.shape_cast %73 : vector<16x16x8xf32> to vector<1x16x16x8xf32>
    tpu.vector_store %arg5[%c0_54, %c1_55, %c1_56, %c0_57], %90 {strides = array<i32>} : memref<1x18x18x8xf32, #tpu.memory_space<vmem>>, vector<1x16x16x8xf32>,
    return
  }
  func.func @transform_0(%arg0: i32) -> (i32, i32, i32, i32) {
    %c0_i32 = arith.constant 0 : i32
    %c0_i32_0 = arith.constant 0 : i32
    %c0_i32_1 = arith.constant 0 : i32
    %c0_i32_2 = arith.constant 0 : i32
    return %arg0, %c0_i32, %c0_i32_0, %c0_i32_1 : i32, i32, i32, i32
  }
  func.func @transform_1(%arg0: i32) -> (i32, i32, i32) {
    %c0_i32 = arith.constant 0 : i32
    %c0_i32_0 = arith.constant 0 : i32
    %c0_i32_1 = arith.constant 0 : i32
    %c0_i32_2 = arith.constant 0 : i32
    return %c0_i32, %c0_i32_0, %c0_i32_1 : i32, i32, i32
  }
  func.func @transform_2(%arg0: i32) -> (i32, i32) {
    %c0_i32 = arith.constant 0 : i32
    %c0_i32_0 = arith.constant 0 : i32
    %c0_i32_1 = arith.constant 0 : i32
    return %c0_i32, %c0_i32_0 : i32, i32
  }
  func.func @transform_3(%arg0: i32) -> (i32, i32) {
    %c0_i32 = arith.constant 0 : i32
    %c0_i32_0 = arith.constant 0 : i32
    %c0_i32_1 = arith.constant 0 : i32
    return %c0_i32, %c0_i32_0 : i32, i32
  }
  func.func @transform_4(%arg0: i32) -> (i32, i32, i32, i32) {
    %c0_i32 = arith.constant 0 : i32
    %c0_i32_0 = arith.constant 0 : i32
    %c0_i32_1 = arith.constant 0 : i32
    %c0_i32_2 = arith.constant 0 : i32
    return %arg0, %c0_i32, %c0_i32_0, %c0_i32_1 : i32, i32, i32, i32
  }
  func.func @transform_5(%arg0: i32) -> (i32, i32, i32) {
    %c0_i32 = arith.constant 0 : i32
    %c0_i32_0 = arith.constant 0 : i32
    %c0_i32_1 = arith.constant 0 : i32
    return %arg0, %c0_i32, %c0_i32_0 : i32, i32, i32
  }
}

</mosaic_0001>

<bundles_post_ra>
// kernel: tpu_custom_call.1
= control target key start
LH: loop header
LB: loop body
LE: loop exit
PB: predicated region body
PF: predicated region fallthrough
CT: control target
= control target key end

     0   :  { %11 = vsyncpa [#allocation3], 0  ;;  %s6262_s0 = inlined_call_operand.vmem [shape: bf16[2,18,18,4], index: 0, kind: input, shape index: {}]   ;;  %s6263_s1 = inlined_call_operand.vmem [shape: bf16[9,4,8], index: 1, kind: input, shape index: {}]   ;;  %s6264_s2 = inlined_call_operand.vmem [shape: f32[1,4], index: 2, kind: input, shape index: {}]   ;;  %s6265_s3 = inlined_call_operand.vmem [shape: f32[1,4], index: 3, kind: input, shape index: {}]   ;;  %s6266_s4 = inlined_call_operand.vmem [shape: f32[2,18,18,8], index: 4, kind: output, shape index: {0}]   ;;  %s6267_s5 = inlined_call_operand.hbm [shape: f32[2,2,8], index: 5, kind: output, shape index: {1}]  }
   0x1   :  { %13 = vsyncpa [#allocation3 + $0x1], 0  ;;  %s4280_s18 = smov 0   ;;  %s4282_s19 = smov 0  }
   0x2   :  { %s4284_s20 = smov 0   ;;  %s4286_s21 = smov 0  }
   0x3 LB: > { %s4301_s2 = sadd.s32 4294967295, %s4246_s21   ;;  %s3339_s3 = sadd.s32 4294967294, %s4246_s21   ;;  %s4246_s21 = sphi %s4286_s21, %s6420_s21   ;;  %s4242_s20 = sphi %s4284_s20, %s6419_s20   ;;  %s4238_s19 = sphi %s4282_s19, %s6418_s19   ;;  %s4234_s18 = sphi %s4280_s18, %s6417_s18  }
   0x4   : > { %s4305_s22 = sadd.s32 1, %s4246_s21   ;;  %s141_s23 = sadd.s32 1, %s4242_s20 }
   0x5   : > { %s138_s24 = ssub.s32 %s4246_s21, %s4305_s22  ;;  %p151_p0 = scmp.ne.s32.totalorder %s4242_s20, %s4238_s19 }
   0x6   : > { %p139_p1 = scmp.eq.s32.totalorder %s138_s24, 0  ;;  %p152_p2 = scmp.eq.s32.totalorder %s4301_s2, 1 }
   0x7   : > { %p157_p3 = scmp.ne.s32.totalorder %s4238_s19, %s4234_s18  ;;  %p158_p4 = scmp.eq.s32.totalorder %s3339_s3, 1 }
   0x8   : > { %s4316_s25 = scalar_select %p139_p1, %s4242_s20, %s141_s23  }
   0x9   : > { %p4318_p5 = por %p152_p2, %p151_p0  ;;  %p4322_p6 = por %p158_p4, %p157_p3 }
   0xa   : > { %p3342_p7 = scmp.ge.s32.totalorder %s4246_s21, 1  ;;  %p193_p8 = scmp.lt.s32.totalorder %s4246_s21, 3 }
   0xc   : > { %p194_p9 = pnand %p3342_p7, %p193_p8 }
   0xe   : > { %197 = sbr.rel (%p194_p9) target bundleno = 638 (0x27e), region = 36 }
  0x13   : > { %v3346_v0 = vld [vmem:[%s6263_s1 + $0x6] sm:$0x3]  ;;  %vm423_vm0 = vcmask 1041408   ;;  %p226_p10 = scmp.lt.s32.totalorder %s4301_s2, 1  ;;  %v291_v2 = vld [vmem:[%s6263_s1] sm:$0x3] }
  0x14   : > { %4103 = vmatprep.subr.msk.bf16.mxu1 %vm423_vm0, %v3346_v0  ;;  %4102 = vmatprep.subr.msk.bf16.mxu0 %vm423_vm0, %v3346_v0  ;;  %v425_v1 = vsel %vm423_vm0, %v3346_v0, 0  ;;  %v3396_v3 = vld [vmem:[%s6263_s1 + $0xc] sm:$0x3]  ;;  %vm2119_vm1 = vcmask 1042432   ;;  %vm2120_vm2 = vcmask 1046532   ;;  %vm374_vm3 = vcmask 31744  }
  0x15   : > { %4101 = vmatpush3.bf16.msra.mxu1 %v425_v1  ;;  %3795 = vmatpush3.bf16.msra.mxu0 %v425_v1  ;;  %s4342_s9 = scalar_select %p226_p10, %s4301_s2, 1  ;;  %vm4362_vm4 = vmor %vm2119_vm1, %vm2120_vm2  ;;  %v771_v23 = vsel %vm423_vm0, %v3396_v3, 0  ;;  %v4410_v26 = vld [vmem:[%s6263_s1 + $0x8] sm:$0x3]  ;;  %v597_v28 = vsel %vm423_vm0, %v291_v2, 0  ;;  %vm2952_vm8 = vcmask 64512  }
  0x16   : > { %4104 = vmatprep.subr.msk.bf16.mxu1 %vm423_vm0, %v291_v2  ;;  %4105 = vmatprep.subr.msk.bf16.mxu0 %vm423_vm0, %v3396_v3  ;;  %v4431_v32 = vld [vmem:[%s6263_s1 + $0x2] sm:$0x3]  ;;  %vm966_vm5 = vsmask.f32 3328  ;;  %vm967_vm6 = vsmask.f32 7440 }
  0x17   : > { %s4112_s10 = smul.u32 216, %s4342_s9  ;;  %vm4486_vm7 = vmor %vm966_vm5, %vm967_vm6  ;;  %vm3158_vm9 = vcmask 58368   ;;  %vm3168_vm10 = vcmask 57344   ;;  %s223_s12 = sand.u32 1, %s4238_s19   ;;  %vm3156_vm11 = vcmask 1040384  }
  0x18   : > { %s4113_s8 = smul.u32 432, %s4342_s9  ;;  %s3638_s14 = sshll.u32 %s4301_s2, 5 }
  0x19   : > { %s4350_s13 = scalar_lea.vmem %s6262_s0, %s4112_s10  ;;  %s6225_s23 = scalar_lea.hbm %s6267_s5, %s3638_s14 }
  0x1a   : > { %v240_v4 = vld [vmem:[%s4350_s13 + $0xc] sm:$0xf]  ;;  %v4354_v5 = vld [vmem:[%s4350_s13 + $0x10] sm:$0xf]  ;;  %v4385_v16 = vld [vmem:[%s4350_s13 + $0x18] sm:$0xf]  ;;  %s5734_s9 = scalar_lea.vmem %s6266_s4, %s4113_s8 }
  0x1b   : > { %v4357_v6 = vld [vmem:[%s4350_s13 + $0x6c] sm:$0xf]  ;;  %v4360_v7 = vcombine.low %v240_v4, %v4354_v5  ;;  %v4367_v9 = vld [vmem:[%s4350_s13 + $0x70] sm:$0xf]  ;;  %v3484_v10 = vrot.slane %v240_v4, 9  ;;  %v6268_v11 = vrot.slane %v4354_v5, 5 }
  0x1c   : > { %v4372_v12 = vcombine.low %v4357_v6, %v4367_v9  ;;  %v994_v13 = vshrl.u32 %v240_v4, 16  ;;  %v997_v14 = vshll.u32 %v240_v4, 16  ;;  %6294 = vst [vmem:[#allocation5_spill] sm:$0xff] %v4385_v16  ;;  %v4388_v17 = vld [vmem:[%s4350_s13 + $0x1c] sm:$0xf]  ;;  %v1003_v39 = vshll.u32 %v4354_v5, 16 }
  0x1d   : > { %3796 = vmatprep.mubr.msk.bf16.mxu0 %vm374_vm3, %v4360_v7  ;;  %v4380_v15 = vsel %vm4362_vm4, %v3484_v10, %v6268_v11  ;;  %6295 = vst [vmem:[#allocation6_spill] sm:$0xff] %v4388_v17  ;;  %v4391_v18 = vld [vmem:[%s4350_s13 + $0x78] sm:$0xf]  ;;  %v4394_v19 = vld [vmem:[%s4350_s13 + $0x7c] sm:$0xf]  ;;  %v4398_v22 = vcombine.low %v4385_v16, %v4388_v17  ;;  %v1007_v51 = vshrl.u32 %v4354_v5, 16 }
  0x1e   : > { %3812 = vmatprep.mubr.msk.bf16.mxu1 %vm374_vm3, %v4372_v12  ;;  %v996_v20 = vrot.slane %v994_v13, 4  ;;  %v999_v21 = vrot.slane %v997_v14, 5  ;;  %v4402_v24 = vld [vmem:[%s4350_s13 + $0x24] sm:$0xf]  ;;  %v4405_v25 = vld [vmem:[%s4350_s13 + $0x28] sm:$0xf]  ;;  %v4416_v27 = vcombine.low %v4391_v18, %v4394_v19 }
  0x1f   : > { %6296 = vst [vmem:[#allocation7_spill] sm:$0xff] %v4402_v24  ;;  %6297 = vst [vmem:[#allocation8_spill] sm:$0xff] %v4405_v25  ;;  %3797 = vmatmul.mubr.msk.bf16.vlgmr.msra.gmra.mxu0 %vm374_vm3, %v4398_v22  ;;  %v4420_v29 = vld [vmem:[%s4350_s13 + $0x84] sm:$0xf]  ;;  %v4423_v30 = vld [vmem:[%s4350_s13 + $0x88] sm:$0xf]  ;;  %v4437_v34 = vcombine.low %v4402_v24, %v4405_v25 }
  0x20   : > { %3863 = vmatpush3.bf16.msra.mxu0 %v771_v23  ;;  %v4426_v31 = vld [vmem:[%s4350_s13 + $0x30] sm:$0xf]  ;;  %v1000_v33 = vor.u32 %v999_v21, %v996_v20  ;;  %3813 = vmatmul.mubr.msk.bf16.vlgmr.msra.gmra.mxu1 %vm374_vm3, %v4416_v27  ;;  %v4440_v35 = vld [vmem:[%s4350_s13 + $0x34] sm:$0xf]  ;;  %v4446_v36 = vcombine.low %v4420_v29, %v4423_v30  ;;  %v4462_v41 = vld [vmem:[%s4350_s13 + $0x3c] sm:$0xf] }
  0x21   : > { %6298 = vst [vmem:[#allocation9_spill] sm:$0xff] %v4426_v31  ;;  %6299 = vst [vmem:[#allocation10_spill] sm:$0xff] %v4440_v35  ;;  %4107 = vmatprep.subr.msk.bf16.mxu0 %vm423_vm0, %v4410_v26  ;;  %3829 = vmatpush3.bf16.msra.mxu1 %v597_v28  ;;  %v4449_v37 = vld [vmem:[%s4350_s13 + $0x90] sm:$0xf]  ;;  %v4452_v38 = vld [vmem:[%s4350_s13 + $0x94] sm:$0xf]  ;;  %v4459_v40 = vcombine.low %v4426_v31, %v4440_v35 }
  0x22   : > { %3800 = vmatprep.mubr.msk.bf16.mxu0 %vm374_vm3, %v4437_v34  ;;  %6300 = vst [vmem:[#allocation11_spill] sm:$0xff] %v4462_v41  ;;  %v4465_v42 = vld [vmem:[%s4350_s13 + $0x40] sm:$0xf]  ;;  %4106 = vmatprep.subr.msk.bf16.mxu1 %vm423_vm0, %v4431_v32  ;;  %v4472_v43 = vld [vmem:[%s4350_s13 + $0x9c] sm:$0xf]  ;;  %v1001_v44 = vrot.slane %v1000_v33, 4  ;;  %v4476_v45 = vcombine.low %v4449_v37, %v4452_v38 }
  0x23   : > { %6301 = vst [vmem:[#allocation12_spill] sm:$0xff] %v4465_v42  ;;  %3816 = vmatprep.mubr.msk.bf16.mxu1 %vm374_vm3, %v4446_v36  ;;  %v4479_v46 = vld [vmem:[%s4350_s13 + $0xa0] sm:$0xf]  ;;  %v4483_v47 = vcombine.low %v4462_v41, %v4465_v42  ;;  %v1005_v49 = vrot.slane %v1003_v39, 5  ;;  %v4500_v52 = vld [vmem:[%s4350_s13 + $0x48] sm:$0xf] }
  0x24   : > { %v4494_v50 = vcombine.low %v4472_v43, %v4479_v46  ;;  %v4503_v53 = vld [vmem:[%s4350_s13 + $0x4c] sm:$0xf]  ;;  %v4508_v54 = vld [vmem:[%s4350_s13 + $0xa8] sm:$0xf]  ;;  %v4518_v57 = vld [vmem:[%s4350_s13 + $0x54] sm:$0xf] }
  0x25   : > { %v1006_v55 = vsel %vm4486_vm7, %v1001_v44, %v1005_v49  ;;  %v4515_v56 = vld [vmem:[%s4350_s13 + $0xac] sm:$0xf]  ;;  %6304 = vst [vmem:[#allocation13_spill] sm:$0xff] %v4518_v57  ;;  %v4521_v58 = vld [vmem:[%s4350_s13 + $0x58] sm:$0xf]  ;;  %v4525_v59 = vcombine.low %v4500_v52, %v4503_v53  ;;  %v1009_v61 = vrot.slane %v1007_v51, 4 }
  0x26   : > { %v4528_v60 = vld [vmem:[%s4350_s13 + $0xb4] sm:$0xf]  ;;  %v4532_v62 = vcombine.low %v4518_v57, %v4521_v58  ;;  %v4535_v63 = vld [vmem:[%s4350_s13 + $0xb8] sm:$0xf]  ;;  %v4539_v0 = vcombine.low %v4508_v54, %v4515_v56  ;;  %v4550_v3 = vld [vmem:[%s4350_s13 + $0x60] sm:$0xf] }
  0x27   : > { %3801 = vmatmul.mubr.msk.bf16.gmra.mxu0 %vm374_vm3, %v4459_v40  ;;  %6305 = vst [vmem:[#allocation14_spill] sm:$0xff] %v4535_v63  ;;  %v4543_v1 = vcombine.low %v4528_v60, %v4535_v63  ;;  %v1010_v2 = vor.u32 %v1009_v61, %v1005_v49  ;;  %v4553_v4 = vld [vmem:[%s4350_s13 + $0x64] sm:$0xf]  ;;  %v4560_v10 = vld [vmem:[%s4350_s13 + $0xc0] sm:$0xf]  ;;  %v1189_v11 = vshll.u32 %v4357_v6, 16 }
  0x28   : > { %3804 = vmatprep.mubr.msk.bf16.mxu0 %vm374_vm3, %v4483_v47  ;;  %3817 = vmatmul.mubr.msk.bf16.gmra.mxu1 %vm374_vm3, %v4476_v45  ;;  %6306 = vst [vmem:[#allocation15_spill] sm:$0xff] %v4560_v10  ;;  %v4563_v13 = vld [vmem:[%s4350_s13 + $0xc4] sm:$0xf]  ;;  %v3354_v14 = vcombine.low %v4550_v3, %v4553_v4  ;;  %v4568_v20 = vld [vmem:[%s4350_s13] sm:$0xf]  ;;  %s3239_s24 = scalar_lea.sflag [#allocation3], %s223_s12 }
  0x29   : > { %3820 = vmatprep.mubr.msk.bf16.mxu1 %vm374_vm3, %v4494_v50  ;;  %6307 = vst [vmem:[#allocation16_spill] sm:$0xff] %v4563_v13  ;;  %v4571_v21 = vld [vmem:[%s4350_s13 + $0x4] sm:$0xf]  ;;  %v4574_v23 = vld [vmem:[%s4350_s13 + $0x14] sm:$0x1]  ;;  %v1011_v28 = vrot.slane %v1010_v2, 4  ;;  %v4579_v39 = vcombine.low %v4560_v10, %v4563_v13 }
  0x2a   : > { %v1013_v33 = vshll.u32 %v4574_v23, 16  ;;  %v3379_v44 = vcombine.low %v4568_v20, %v4571_v21  ;;  %v1680_v2 = vsel %vm423_vm0, %v4410_v26, 0  ;;  %v3499_v13 = vld [vmem:[%s6263_s1 + $0x4] sm:$0x3]  ;;  %v4611_v26 = vld [vmem:[%s6263_s1 + $0xe] sm:$0x3] }
  0x2b   : > { %s4249_s2 = smov [#allocation2]  }
  0x2c   : > { %v1015_v49 = vrot.slane %v1013_v33, 5  ;;  %v1186_v33 = vshrl.u32 %v4357_v6, 16  ;;  %s4190_s29 = sshll.u32 %s4249_s2, 4  ;;  %s4191_s29 = int_to_ptr.vmem [resolvable:$false] %s4190_s29 }
  0x2d   : > { %s4192_s30 = scalar_lea.vmem %s4191_s29, 64 }
  0x2e   : > { %v1016_v51 = vsel %vm4486_vm7, %v1011_v28, %v1015_v49  ;;  %v1195_v28 = vshll.u32 %v4367_v9, 16  ;;  %v1199_v49 = vshrl.u32 %v4367_v9, 16 }
  0x2f   : > { %3805 = vmatmul.mubr.msk.bf16.gmra.mxu0 %vm374_vm3, %v4525_v59  ;;  %v4590_v61 = vcombine.low %v1006_v55, %v1016_v51  ;;  %v1452_v55 = vsel %vm423_vm0, %v4431_v32, 0  ;;  %v1191_v51 = vrot.slane %v1189_v11, 5 }
  0x30   : > { %3808 = vmatprep.mubr.msk.bf16.mxu0 %vm374_vm3, %v4532_v62  ;;  %3821 = vmatmul.mubr.msk.bf16.gmra.mxu1 %vm374_vm3, %v4539_v0  ;;  %v1197_v32 = vrot.slane %v1195_v28, 5 }
  0x31   : > { %3824 = vmatprep.mubr.msk.bf16.mxu1 %vm374_vm3, %v4543_v1 }
  0x37   : > { %3809 = vmatmul.mubr.msk.bf16.gmra.mxu0 %vm374_vm3, %v3354_v14 }
  0x38   : > { %3864 = vmatprep.mubr.msk.bf16.mxu0 %vm374_vm3, %v4398_v22  ;;  %3825 = vmatmul.mubr.msk.bf16.gmra.mxu1 %vm374_vm3, %v4579_v39 }
  0x39   : > { %3830 = vmatprep.mubr.msk.bf16.mxu1 %vm374_vm3, %v3379_v44  ;;  %v1188_v44 = vrot.slane %v1186_v33, 4 }
  0x3b   : > { %v1192_v10 = vor.u32 %v1191_v51, %v1188_v44  ;;  %v1031_v44 = vshrl.u32 %v4388_v17, 16  ;;  %v970_v51 = vshrl.u32 %v4568_v20, 16 }
  0x3d   : > { %v1193_v11 = vrot.slane %v1192_v10, 4  ;;  %v1027_v10 = vshll.u32 %v4388_v17, 16 }
  0x3f   : > { %3865 = vmatmul.mubr.msk.bf16.vlgmr.msra.gmra.mxu0 %vm374_vm3, %v4437_v34  ;;  %v1198_v28 = vsel %vm4486_vm7, %v1193_v11, %v1197_v32  ;;  %v2134_v11 = vrot.slane %v4574_v23, 5  ;;  %v1055_v23 = vshrl.u32 %v4405_v25, 16 }
  0x40   : > { %3931 = vmatpush3.bf16.msra.mxu0 %v1680_v2  ;;  %3868 = vmatprep.mubr.msk.bf16.mxu0 %vm374_vm3, %v4459_v40  ;;  %v1201_v2 = vrot.slane %v1199_v49, 4 }
  0x41   : > { %3831 = vmatmul.mubr.msk.bf16.vlgmr.msra.gmra.mxu1 %vm374_vm3, %v4360_v7  ;;  %4109 = vmatprep.subr.msk.bf16.mxu0 %vm423_vm0, %v3499_v13  ;;  %v4625_v7 = vld [vmem:[%s4350_s13 + $0x74] sm:$0x1] }
  0x42   : > { %3897 = vmatpush3.bf16.msra.mxu1 %v1452_v55  ;;  %3834 = vmatprep.mubr.msk.bf16.mxu1 %vm374_vm3, %v4398_v22  ;;  %v1202_v63 = vor.u32 %v1201_v2, %v1197_v32  ;;  %v1205_v33 = vshll.u32 %v4625_v7, 16  ;;  %v973_v32 = vshll.u32 %v4568_v20, 16  ;;  %v983_v2 = vshrl.u32 %v4571_v21, 16 }
  0x43   : > { %4108 = vmatprep.subr.msk.bf16.mxu1 %vm423_vm0, %v4611_v26 }
  0x44   : > { %v1203_v22 = vrot.slane %v1202_v63, 4  ;;  %v1207_v49 = vrot.slane %v1205_v33, 5  ;;  %v1021_v63 = vshll.u32 %v4385_v16, 16  ;;  %v4673_v33 = vsel %vm423_vm0, %v3499_v13, 0 }
  0x45   : > { %v975_v17 = vrot.slane %v973_v32, 5  ;;  %v985_v13 = vrot.slane %v983_v2, 4  ;;  %v1066_v2 = vshrl.u32 %v4426_v31, 16 }
  0x46   : > { %v1208_v55 = vsel %vm4486_vm7, %v1203_v22, %v1207_v49  ;;  %v4676_v49 = vrot.slane %v1027_v10, 5 }
  0x47   : > { %3869 = vmatmul.mubr.msk.bf16.gmra.mxu0 %vm374_vm3, %v4483_v47 }
  0x48   : > { %3872 = vmatprep.mubr.msk.bf16.mxu0 %vm374_vm3, %v4525_v59 }
  0x49   : > { %3835 = vmatmul.mubr.msk.bf16.gmra.mxu1 %vm374_vm3, %v4437_v34  ;;  %v4639_v34 = vcombine.low %v1198_v28, %v1208_v55  ;;  %v1033_v55 = vrot.slane %v1031_v44, 4  ;;  %v2187_v44 = vrot.slane %v4367_v9, 5 }
  0x4a   : > { %3838 = vmatprep.mubr.msk.bf16.mxu1 %vm374_vm3, %v4459_v40  ;;  %v1018_v40 = vshrl.u32 %v4385_v16, 16  ;;  %v972_v16 = vrot.slane %v970_v51, 4 }
  0x4b   : > { %v1034_v32 = vor.u32 %v1033_v55, %v4676_v49  ;;  %v4715_v55 = vld [vmem:[%s4350_s13 + $0x20] sm:$0x1] }
  0x4f   : > { %3873 = vmatmul.mubr.msk.bf16.gmra.mxu0 %vm374_vm3, %v4532_v62 }
  0x50   : > { %3876 = vmatprep.mubr.msk.bf16.mxu0 %vm374_vm3, %v3354_v14 }
  0x51   : > { %3839 = vmatmul.mubr.msk.bf16.gmra.mxu1 %vm374_vm3, %v4483_v47  ;;  %v1020_v47 = vrot.slane %v1018_v40, 4  ;;  %v1042_v40 = vshrl.u32 %v4402_v24, 16 }
  0x52   : > { %3842 = vmatprep.mubr.msk.bf16.mxu1 %vm374_vm3, %v4525_v59  ;;  %v1023_v59 = vrot.slane %v1021_v63, 5  ;;  %v239_v63 = vld [vmem:[%s4350_s13 + $0x8] sm:$0x1] }
  0x53   : > { %v2127_v22 = vrot.slane %v239_v63, 5 }
  0x54   : > { %v1024_v28 = vor.u32 %v1023_v59, %v1020_v47  ;;  %v1051_v59 = vshll.u32 %v4405_v25, 16 }
  0x56   : > { %v4695_v51 = vrot.slane %v1024_v28, 4  ;;  %v1079_v28 = vshrl.u32 %v4440_v35, 16 }
  0x57   : > { %3877 = vmatmul.mubr.msk.bf16.gmra.mxu0 %vm374_vm3, %v4372_v12 }
  0x58   : > { %3880 = vmatprep.mubr.msk.bf16.mxu0 %vm374_vm3, %v4416_v27 }
  0x59   : > { %3843 = vmatmul.mubr.msk.bf16.gmra.mxu1 %vm374_vm3, %v4532_v62  ;;  %v6308_v62 = vrot.slane %v4354_v5, 5  ;;  %v979_v5 = vshll.u32 %v4571_v21, 16 }
  0x5a   : > { %3846 = vmatprep.mubr.msk.bf16.mxu1 %vm374_vm3, %v3354_v14 }
  0x5b   : > { %v2133_v14 = vrot.slane %v6308_v62, 4  ;;  %v2124_v62 = vrot.slane %v4571_v21, 5  ;;  %v4687_v47 = vrot.slane %v979_v5, 5 }
  0x5d   : > { %v2126_v21 = vrot.slane %v2124_v62, 4 }
  0x5f   : > { %3881 = vmatmul.mubr.msk.bf16.gmra.mxu0 %vm374_vm3, %v4446_v36  ;;  %v4708_v9 = vsel %vm4362_vm4, %v2126_v21, %v2127_v22  ;;  %v4721_v22 = vld [vmem:[%s4350_s13 + $0x2c] sm:$0x1]  ;;  %v4725_v21 = vrot.slane %v1034_v32, 4 }
  0x60   : > { %3884 = vmatprep.mubr.msk.bf16.mxu0 %vm374_vm3, %v4476_v45  ;;  %6311 = vst [vmem:[#allocation19_spill] sm:$0xff] %v4708_v9  ;;  %6312 = vst [vmem:[#allocation20_spill] sm:$0xff] %v4721_v22  ;;  %v1061_v32 = vshll.u32 %v4721_v22, 16  ;;  %v4766_v9 = vld [vmem:[%s4350_s13 + $0x38] sm:$0x1] }
  0x61   : > { %3847 = vmatmul.mubr.msk.bf16.gmra.mxu1 %vm374_vm3, %v4372_v12  ;;  %v3483_v12 = vrot.slane %v4568_v20, 9  ;;  %v2135_v20 = vsel %vm4362_vm4, %v2133_v14, %v2134_v11  ;;  %v1044_v11 = vrot.slane %v1042_v40, 4  ;;  %v986_v40 = vor.u32 %v985_v13, %v4687_v47 }
  0x62   : > { %3850 = vmatprep.mubr.msk.bf16.mxu1 %vm374_vm3, %v4416_v27  ;;  %v1045_v27 = vshll.u32 %v4402_v24, 16  ;;  %v4701_v14 = vcombine.low %v4380_v15, %v2135_v20  ;;  %v976_v15 = vor.u32 %v975_v17, %v972_v16  ;;  %v1057_v20 = vrot.slane %v1055_v23, 4 }
  0x63   : > { %v4692_v10 = vsel %vm4362_vm4, %v3483_v12, %v2124_v62  ;;  %v1069_v12 = vshll.u32 %v4426_v31, 16  ;;  %v4723_v62 = vrot.slane %v1051_v59, 5  ;;  %v1093_v16 = vshll.u32 %v4462_v41, 16  ;;  %v4734_v31 = vld [vmem:[%s4350_s13 + $0xcc] sm:$0xf] }
  0x64   : > { %6309 = vst [vmem:[#allocation17_spill] sm:$0xff] %v4692_v10  ;;  %6310 = vst [vmem:[#allocation18_spill] sm:$0xff] %v4701_v14  ;;  %v1047_v5 = vrot.slane %v1045_v27, 5  ;;  %v989_v27 = vshll.u32 %v239_v63, 16  ;;  %v1103_v17 = vshrl.u32 %v4465_v42, 16  ;;  %v1037_v13 = vshll.u32 %v4715_v55, 16 }
  0x65   : > { %v4737_v59 = vld [vmem:[%s4350_s13 + $0xd0] sm:$0xf]  ;;  %v977_v23 = vrot.slane %v976_v15, 4  ;;  %v1127_v24 = vshrl.u32 %v4503_v53, 16  ;;  %v1058_v14 = vor.u32 %v1057_v20, %v4723_v62  ;;  %v1075_v15 = vshll.u32 %v4440_v35, 16 }
  0x66   : > { %v1048_v63 = vor.u32 %v1047_v5, %v1044_v11  ;;  %v991_v25 = vrot.slane %v989_v27, 5  ;;  %v1141_v11 = vshll.u32 %v4518_v57, 16  ;;  %v1030_v5 = vsel %vm4486_vm7, %v4695_v51, %v4676_v49 }
  0x67   : > { %3885 = vmatmul.mubr.msk.bf16.gmra.mxu0 %vm374_vm3, %v4494_v50  ;;  %v1039_v27 = vrot.slane %v1037_v13, 5  ;;  %v1063_v49 = vrot.slane %v1061_v32, 5  ;;  %v1068_v51 = vrot.slane %v1066_v2, 4  ;;  %v1071_v22 = vrot.slane %v1069_v12, 5 }
  0x68   : > { %3888 = vmatprep.mubr.msk.bf16.mxu0 %vm374_vm3, %v4539_v0  ;;  %v1049_v20 = vrot.slane %v1048_v63, 4  ;;  %v1059_v35 = vrot.slane %v1058_v14, 4  ;;  %v1081_v13 = vrot.slane %v1079_v28, 4  ;;  %v1095_v10 = vrot.slane %v1093_v16, 5 }
  0x69   : > { %3851 = vmatmul.mubr.msk.bf16.gmra.mxu1 %vm374_vm3, %v4446_v36  ;;  %v1138_v36 = vshrl.u32 %v4518_v57, 16  ;;  %v1099_v57 = vshll.u32 %v4465_v42, 16  ;;  %v4768_v42 = vrot.slane %v1075_v15, 5  ;;  %v1151_v2 = vshrl.u32 %v4521_v58, 16 }
  0x6a   : > { %3854 = vmatprep.mubr.msk.bf16.mxu1 %vm374_vm3, %v4476_v45  ;;  %v1090_v45 = vshrl.u32 %v4462_v41, 16  ;;  %v987_v41 = vrot.slane %v986_v40, 4  ;;  %v3397_v40 = vcombine.low %v4734_v31, %v4737_v59  ;;  %v1162_v12 = vshrl.u32 %v4550_v3, 16 }
  0x6b   : > { %v1072_v32 = vor.u32 %v1071_v22, %v1068_v51  ;;  %v1085_v28 = vshll.u32 %v4766_v9, 16  ;;  %v2190_v16 = vrot.slane %v4625_v7, 5  ;;  %v1123_v22 = vshll.u32 %v4503_v53, 16 }
  0x6c   : > { %v1092_v63 = vrot.slane %v1090_v45, 4  ;;  %v4780_v45 = vld [vmem:[%s4350_s13 + $0x44] sm:$0x1]  ;;  %v1064_v7 = vsel %vm4486_vm7, %v1059_v35, %v1063_v49  ;;  %v6315_v49 = vshrl.u32 %v4500_v52, 16 }
  0x6e   : > { %v1096_v15 = vor.u32 %v1095_v10, %v1092_v63  ;;  %v1073_v10 = vrot.slane %v1072_v32, 4  ;;  %v1116_v51 = vrot.slane %v6315_v49, 4  ;;  %v4815_v63 = vrot.slane %v1123_v22, 5 }
  0x6f   : > { %3889 = vmatmul.mubr.msk.bf16.gmra.mxu0 %vm374_vm3, %v4543_v1  ;;  %v1908_v22 = vsel %vm423_vm0, %v4611_v26, 0  ;;  %v1210_v49 = vshrl.u32 %v4391_v18, 16 }
  0x70   : > { %3892 = vmatprep.mubr.msk.bf16.mxu0 %vm374_vm3, %v4579_v39  ;;  %v982_v39 = vsel %vm4486_vm7, %v977_v23, %v4687_v47  ;;  %v2189_v23 = vrot.slane %v2187_v44, 4 }
  0x71   : > { %3855 = vmatmul.mubr.msk.bf16.gmra.mxu1 %vm374_vm3, %v4494_v50  ;;  %v992_v50 = vsel %vm4486_vm7, %v987_v41, %v991_v25  ;;  %v4776_v25 = vrot.slane %v1099_v57, 5  ;;  %v1105_v41 = vrot.slane %v1103_v17, 4  ;;  %v1054_v57 = vsel %vm4486_vm7, %v1049_v20, %v4723_v62 }
  0x72   : > { %3858 = vmatprep.mubr.msk.bf16.mxu1 %vm374_vm3, %v4539_v0  ;;  %v6313_v0 = vrot.slane %v4357_v6, 9  ;;  %v3415_v14 = vcombine.low %v982_v39, %v992_v50  ;;  %v1165_v6 = vshll.u32 %v4550_v3, 16  ;;  %v1082_v17 = vor.u32 %v1081_v13, %v4768_v42 }
  0x73   : > { %v1106_v62 = vor.u32 %v1105_v41, %v4776_v25  ;;  %v1087_v39 = vrot.slane %v1085_v28, 5  ;;  %v6316_v50 = vshll.u32 %v4500_v52, 16  ;;  %v4818_v41 = vld [vmem:[%s4350_s13 + $0x50] sm:$0x1]  ;;  %v4821_v28 = vld [vmem:[%s4350_s13 + $0x5c] sm:$0x1] }
  0x74   : > { %v2188_v47 = vsel %vm4362_vm4, %v6313_v0, %v2187_v44  ;;  %v1040_v44 = vsel %vm4486_vm7, %v4725_v21, %v1039_v27  ;;  %v1109_v21 = vshll.u32 %v4780_v45, 16  ;;  %v1147_v27 = vshll.u32 %v4521_v58, 16 }
  0x75   : > { %v4807_v35 = vcombine.low %v1030_v5, %v1040_v44  ;;  %v1119_v13 = vrot.slane %v6316_v50, 5  ;;  %v1129_v0 = vrot.slane %v1127_v24, 4  ;;  %v1143_v5 = vrot.slane %v1141_v11, 5 }
  0x76   : > { %v1111_v32 = vrot.slane %v1109_v21, 5  ;;  %v4823_v44 = vrot.slane %v1147_v27, 5  ;;  %v1171_v24 = vshll.u32 %v4553_v4, 16  ;;  %v1133_v26 = vshll.u32 %v4818_v41, 16  ;;  %v4853_v21 = vld [vmem:[%s6263_s1 + $0xa] sm:$0x3] }
  0x77   : > { %3893 = vmatmul.mubr.msk.bf16.gmra.mxu0 %vm374_vm3, %v3397_v40  ;;  %v2191_v40 = vsel %vm4362_vm4, %v2189_v23, %v2190_v16  ;;  %v1097_v23 = vrot.slane %v1096_v15, 4  ;;  %v1107_v16 = vrot.slane %v1106_v62, 4  ;;  %v1120_v11 = vor.u32 %v1119_v13, %v1116_v51 }
  0x78   : > { %3932 = vmatprep.mubr.msk.bf16.mxu0 %vm374_vm3, %v4590_v61  ;;  %v4804_v20 = vcombine.low %v2188_v47, %v2191_v40  ;;  %v1083_v47 = vrot.slane %v1082_v17, 4  ;;  %v4832_v17 = vld [vmem:[%s6263_s1 + $0x10] sm:$0x3]  ;;  %v4868_v51 = vrot.slane %v1171_v24, 5 }
  0x79   : > { %3859 = vmatmul.mubr.msk.bf16.gmra.mxu1 %vm374_vm3, %v4543_v1  ;;  %v4811_v1 = vcombine.low %v1054_v57, %v1064_v7  ;;  %v1153_v57 = vrot.slane %v1151_v2, 4  ;;  %v1175_v7 = vshrl.u32 %v4553_v4, 16  ;;  %v1130_v2 = vor.u32 %v1129_v0, %v4815_v63 }
  0x7a   : > { %6314 = vst [vmem:[#allocation21_spill] sm:$0xff] %v4804_v20  ;;  %3898 = vmatprep.mubr.msk.bf16.mxu1 %vm374_vm3, %v3415_v14  ;;  %v1140_v14 = vrot.slane %v1138_v36, 4  ;;  %v1078_v36 = vsel %vm4486_vm7, %v1073_v10, %v4768_v42  ;;  %v1088_v15 = vsel %vm4486_vm7, %v1083_v47, %v1087_v39  ;;  %v1102_v40 = vsel %vm4486_vm7, %v1097_v23, %v4776_v25  ;;  %v4861_v10 = vld [vmem:[%s4350_s13 + $0x68] sm:$0x1] }
  0x7b   : > { %v1157_v42 = vshll.u32 %v4821_v28, 16  ;;  %v1154_v27 = vor.u32 %v1153_v57, %v4823_v44  ;;  %v1164_v39 = vrot.slane %v1162_v12, 4  ;;  %v1167_v25 = vrot.slane %v1165_v6, 5 }
  0x7c   : > { %v1144_v62 = vor.u32 %v1143_v5, %v1140_v14  ;;  %v4870_v50 = vcombine.low %v1078_v36, %v1088_v15  ;;  %v1121_v13 = vrot.slane %v1120_v11, 4  ;;  %v1131_v0 = vrot.slane %v1130_v2, 4 }
  0x7d   : > { %v1135_v47 = vrot.slane %v1133_v26, 5  ;;  %v1213_v12 = vshll.u32 %v4391_v18, 16  ;;  %v1181_v14 = vshll.u32 %v4861_v10, 16  ;;  %v1223_v5 = vshrl.u32 %v4394_v19, 16 }
  0x7e   : > { %v1145_v23 = vrot.slane %v1144_v62, 4  ;;  %v1168_v57 = vor.u32 %v1167_v25, %v1164_v39  ;;  %v1219_v36 = vshll.u32 %v4394_v19, 16  ;;  %v1247_v18 = vshrl.u32 %v4423_v30, 16 }
  0x7f   : > { %3933 = vmatmul.mubr.msk.bf16.vlgmr.msra.gmra.mxu0 %vm374_vm3, %v4807_v35  ;;  %v1126_v11 = vsel %vm4486_vm7, %v1121_v13, %v4815_v63  ;;  %v1136_v2 = vsel %vm4486_vm7, %v1131_v0, %v1135_v47  ;;  %v1212_v26 = vrot.slane %v1210_v49, 4  ;;  %v1243_v15 = vshll.u32 %v4423_v30, 16 }
  0x80   : > { %3999 = vmatpush3.bf16.msra.mxu0 %v4673_v33  ;;  %3936 = vmatprep.mubr.msk.bf16.mxu0 %vm374_vm3, %v4811_v1  ;;  %v1112_v33 = vsel %vm4486_vm7, %v1107_v16, %v1111_v32  ;;  %v1155_v16 = vrot.slane %v1154_v27, 4  ;;  %v1159_v32 = vrot.slane %v1157_v42, 5  ;;  %v1150_v19 = vsel %vm4486_vm7, %v1145_v23, %v4823_v44  ;;  %v4904_v27 = vld [vmem:[%s4350_s13 + $0x80] sm:$0x1] }
  0x81   : > { %3899 = vmatmul.mubr.msk.bf16.vlgmr.msra.gmra.mxu1 %vm374_vm3, %v4590_v61  ;;  %4111 = vmatprep.subr.msk.bf16.mxu0 %vm423_vm0, %v4832_v17  ;;  %v1177_v61 = vrot.slane %v1175_v7, 4  ;;  %v4875_v6 = vcombine.low %v1102_v40, %v1112_v33  ;;  %v1234_v7 = vshrl.u32 %v4420_v29, 16  ;;  %v1169_v40 = vrot.slane %v1168_v57, 4 }
  0x82   : > { %3965 = vmatpush3.bf16.msra.mxu1 %v1908_v22  ;;  %3902 = vmatprep.mubr.msk.bf16.mxu1 %vm374_vm3, %v4807_v35  ;;  %v1237_v22 = vshll.u32 %v4420_v29, 16  ;;  %v1183_v29 = vrot.slane %v1181_v14, 5  ;;  %v1160_v63 = vsel %vm4486_vm7, %v1155_v16, %v1159_v32  ;;  %v1215_v62 = vrot.slane %v1213_v12, 5 }
  0x83   : > { %4110 = vmatprep.subr.msk.bf16.mxu1 %vm423_vm0, %v4853_v21  ;;  %v1178_v24 = vor.u32 %v1177_v61, %v4868_v51  ;;  %v1225_v42 = vrot.slane %v1223_v5, 4  ;;  %v4906_v44 = vrot.slane %v1219_v36, 5  ;;  %v1236_v39 = vrot.slane %v1234_v7, 4  ;;  %v4913_v61 = vld [vmem:[%s4350_s13 + $0x8c] sm:$0x1] }
  0x84   : > { %v1239_v25 = vrot.slane %v1237_v22, 5  ;;  %v4908_v30 = vcombine.low %v1126_v11, %v1136_v2  ;;  %v4910_v49 = vcombine.low %v1150_v19, %v1160_v63  ;;  %v4915_v13 = vrot.slane %v1243_v15, 5 }
  0x85   : > { %v1179_v33 = vrot.slane %v1178_v24, 4  ;;  %v1249_v0 = vrot.slane %v1247_v18, 4  ;;  %v1258_v47 = vshrl.u32 %v4449_v37, 16  ;;  %v1261_v12 = vshll.u32 %v4449_v37, 16 }
  0x86   : > { %v1216_v23 = vor.u32 %v1215_v62, %v1212_v26  ;;  %v1229_v14 = vshll.u32 %v4904_v27, 16  ;;  %v1174_v5 = vsel %vm4486_vm7, %v1169_v40, %v4868_v51  ;;  %v1226_v32 = vor.u32 %v1225_v42, %v4906_v44  ;;  %v4945_v40 = vld [vmem:[%s4350_s13 + $0x98] sm:$0x1] }
  0x87   : > { %3937 = vmatmul.mubr.msk.bf16.gmra.mxu0 %vm374_vm3, %v4870_v50  ;;  %v1184_v16 = vsel %vm4486_vm7, %v1179_v33, %v1183_v29  ;;  %v1240_v57 = vor.u32 %v1239_v25, %v1236_v39  ;;  %v1271_v7 = vshrl.u32 %v4452_v38, 16  ;;  %v1282_v22 = vshrl.u32 %v4472_v43, 16  ;;  %v4950_v39 = vld [vmem:[%s4350_s13 + $0xa4] sm:$0x1] }
  0x88   : > { %3940 = vmatprep.mubr.msk.bf16.mxu0 %vm374_vm3, %v4875_v6  ;;  %v1253_v37 = vshll.u32 %v4913_v61, 16  ;;  %v1267_v24 = vshll.u32 %v4452_v38, 16  ;;  %v1285_v51 = vshll.u32 %v4472_v43, 16  ;;  %v1295_v36 = vshrl.u32 %v4479_v46, 16  ;;  %6317 = vst [vmem:[#allocation22_spill] sm:$0xff] %v4950_v39 }
  0x89   : > { %3903 = vmatmul.mubr.msk.bf16.gmra.mxu1 %vm374_vm3, %v4811_v1  ;;  %v1250_v18 = vor.u32 %v1249_v0, %v4915_v13  ;;  %v1291_v11 = vshll.u32 %v4479_v46, 16  ;;  %v4940_v2 = vcombine.low %v1174_v5, %v1184_v16  ;;  %v1217_v19 = vrot.slane %v1216_v23, 4 }
  0x8a   : > { %3906 = vmatprep.mubr.msk.bf16.mxu1 %vm374_vm3, %v4870_v50  ;;  %v1231_v38 = vrot.slane %v1229_v14, 5  ;;  %v1227_v43 = vrot.slane %v1226_v32, 4  ;;  %v1241_v29 = vrot.slane %v1240_v57, 4  ;;  %v1260_v26 = vrot.slane %v1258_v47, 4 }
  0x8b   : > { %v1263_v15 = vrot.slane %v1261_v12, 5  ;;  %v1255_v63 = vrot.slane %v1253_v37, 5  ;;  %v4947_v62 = vrot.slane %v1267_v24, 5  ;;  %v1273_v46 = vrot.slane %v1271_v7, 4 }
  0x8c   : > { %v1284_v42 = vrot.slane %v1282_v22, 4  ;;  %v1251_v33 = vrot.slane %v1250_v18, 4  ;;  %v1287_v25 = vrot.slane %v1285_v51, 5  ;;  %v1293_v0 = vrot.slane %v1291_v11, 5 }
  0x8d   : > { %v1297_v23 = vrot.slane %v1295_v36, 4  ;;  %v1306_v14 = vshrl.u32 %v4508_v54, 16  ;;  %v1309_v5 = vshll.u32 %v4508_v54, 16  ;;  %v1319_v47 = vshrl.u32 %v4515_v56, 16 }
  0x8e   : > { %v1222_v12 = vsel %vm4486_vm7, %v1217_v19, %v4906_v44  ;;  %v1264_v16 = vor.u32 %v1263_v15, %v1260_v26  ;;  %v1277_v32 = vshll.u32 %v4945_v40, 16  ;;  %v1232_v57 = vsel %vm4486_vm7, %v1227_v43, %v1231_v38 }
  0x8f   : > { %3941 = vmatmul.mubr.msk.bf16.gmra.mxu0 %vm374_vm3, %v4908_v30  ;;  %v1246_v7 = vsel %vm4486_vm7, %v1241_v29, %v4915_v13  ;;  %v1274_v54 = vor.u32 %v1273_v46, %v4947_v62  ;;  %v1301_v22 = vshll.u32 %v4950_v39, 16  ;;  %v1256_v44 = vsel %vm4486_vm7, %v1251_v33, %v1255_v63  ;;  %v6318_v13 = vld [vmem:[#allocation14_spill] sm:$0xff] }
  0x90   : > { %3944 = vmatprep.mubr.msk.bf16.mxu0 %vm374_vm3, %v4910_v49  ;;  %v1288_v37 = vor.u32 %v1287_v25, %v1284_v42  ;;  %v1298_v24 = vor.u32 %v1297_v23, %v1293_v0  ;;  %v1315_v51 = vshll.u32 %v4515_v56, 16  ;;  %v1330_v36 = vshrl.u32 %v4528_v60, 16  ;;  %v4986_v33 = vld [vmem:[%s4350_s13 + $0xb0] sm:$0x1] }
  0x91   : > { %3907 = vmatmul.mubr.msk.bf16.gmra.mxu1 %vm374_vm3, %v4875_v6  ;;  %v1333_v18 = vshll.u32 %v4528_v60, 16  ;;  %v1343_v11 = vshrl.u32 %v6318_v13, 16  ;;  %v1339_v19 = vshll.u32 %v6318_v13, 16  ;;  %v4981_v38 = vcombine.low %v1222_v12, %v1232_v57  ;;  %v6319_v57 = vld [vmem:[#allocation15_spill] sm:$0xff] }
  0x92   : > { %3910 = vmatprep.mubr.msk.bf16.mxu1 %vm374_vm3, %v4908_v30  ;;  %v1265_v43 = vrot.slane %v1264_v16, 4  ;;  %v1279_v29 = vrot.slane %v1277_v32, 5  ;;  %v1308_v56 = vrot.slane %v1306_v14, 4  ;;  %v4983_v26 = vcombine.low %v1246_v7, %v1256_v44  ;;  %v6320_v32 = vld [vmem:[#allocation16_spill] sm:$0xff] }
  0x93   : > { %v1275_v15 = vrot.slane %v1274_v54, 4  ;;  %v1303_v60 = vrot.slane %v1301_v22, 5  ;;  %v1311_v63 = vrot.slane %v1309_v5, 5  ;;  %v1289_v46 = vrot.slane %v1288_v37, 4  ;;  %v4992_v44 = vld [vmem:[%s4350_s13 + $0xbc] sm:$0x1] }
  0x94   : > { %v1299_v42 = vrot.slane %v1298_v24, 4  ;;  %v1317_v25 = vrot.slane %v1315_v51, 5  ;;  %v1321_v23 = vrot.slane %v1319_v47, 4  ;;  %v1332_v13 = vrot.slane %v1330_v36, 4 }
  0x95   : > { %v1335_v39 = vrot.slane %v1333_v18, 5  ;;  %v1341_v20 = vrot.slane %v1339_v19, 5  ;;  %v1345_v12 = vrot.slane %v1343_v11, 4  ;;  %v1648_v16 = vshrl.u32 %v6319_v57, 16 }
  0x96   : > { %v1651_v14 = vshll.u32 %v6319_v57, 16  ;;  %v1661_v7 = vshrl.u32 %v6320_v32, 16  ;;  %v1270_v5 = vsel %vm4486_vm7, %v1265_v43, %v4947_v62  ;;  %v1280_v47 = vsel %vm4486_vm7, %v1275_v15, %v1279_v29 }
  0x97   : > { %3945 = vmatmul.mubr.msk.bf16.gmra.mxu0 %vm374_vm3, %v4940_v2  ;;  %v1312_v54 = vor.u32 %v1311_v63, %v1308_v56  ;;  %v1325_v22 = vshll.u32 %v4986_v33, 16  ;;  %v1294_v37 = vsel %vm4486_vm7, %v1289_v46, %v1293_v0  ;;  %v1304_v24 = vsel %vm4486_vm7, %v1299_v42, %v1303_v60 }
  0x98   : > { %3948 = vmatprep.mubr.msk.bf16.mxu0 %vm374_vm3, %v4639_v34  ;;  %v1322_v51 = vor.u32 %v1321_v23, %v1317_v25  ;;  %v1657_v36 = vshll.u32 %v6320_v32, 16  ;;  %v1336_v62 = vor.u32 %v1335_v39, %v1332_v13  ;;  %v1346_v18 = vor.u32 %v1345_v12, %v1341_v20  ;;  %v5019_v13 = vld [vmem:[%s4350_s13 + $0xc8] sm:$0x1] }
  0x99   : > { %3911 = vmatmul.mubr.msk.bf16.gmra.mxu1 %vm374_vm3, %v4910_v49  ;;  %v1349_v11 = vshll.u32 %v4992_v44, 16  ;;  %v5014_v19 = vcombine.low %v1270_v5, %v1280_v47  ;;  %v5016_v0 = vcombine.low %v1294_v37, %v1304_v24  ;;  %v1313_v43 = vrot.slane %v1312_v54, 4 }
  0x9a   : > { %3914 = vmatprep.mubr.msk.bf16.mxu1 %vm374_vm3, %v4940_v2  ;;  %v1327_v29 = vrot.slane %v1325_v22, 5  ;;  %v1650_v56 = vrot.slane %v1648_v16, 4  ;;  %v1323_v15 = vrot.slane %v1322_v51, 4  ;;  %v1653_v60 = vrot.slane %v1651_v14, 5 }
  0x9b   : > { %v1659_v63 = vrot.slane %v1657_v36, 5  ;;  %v1663_v46 = vrot.slane %v1661_v7, 4  ;;  %v1337_v42 = vrot.slane %v1336_v62, 4  ;;  %v1347_v39 = vrot.slane %v1346_v18, 4  ;;  %v6321_v36 = vld [vmem:[#allocation6_spill] sm:$0xff] }
  0x9c   : > { %v1351_v23 = vrot.slane %v1349_v11, 5  ;;  %v1318_v12 = vsel %vm4486_vm7, %v1313_v43, %v1317_v25  ;;  %v1328_v57 = vsel %vm4486_vm7, %v1323_v15, %v1327_v29  ;;  %v1654_v16 = vor.u32 %v1653_v60, %v1650_v56  ;;  %v5055_v18 = vld [vmem:[%s4350_s13 + $0xd4] sm:$0x1]  ;;  %v6322_v15 = vld [vmem:[#allocation5_spill] sm:$0xff] }
  0x9d   : > { %v1664_v14 = vor.u32 %v1663_v46, %v1659_v63  ;;  %v1667_v32 = vshll.u32 %v5019_v13, 16  ;;  %v1342_v7 = vsel %vm4486_vm7, %v1337_v42, %v1341_v20  ;;  %v5038_v5 = vcombine.low %v1318_v12, %v1328_v57  ;;  %v6323_v12 = vld [vmem:[#allocation17_spill] sm:$0xff]  ;;  %v6324_v57 = vld [vmem:[#allocation19_spill] sm:$0xff] }
  0x9e   : > { %v1352_v25 = vsel %vm4486_vm7, %v1347_v39, %v1351_v23  ;;  %v1655_v54 = vrot.slane %v1654_v16, 4  ;;  %v2743_v24 = vrot.slane %v4737_v59, 5  ;;  %v2138_v62 = vrot.slane %v6321_v36, 5 }
  0x9f   : > { %3949 = vmatmul.mubr.msk.bf16.gmra.mxu0 %vm374_vm3, %v4981_v38  ;;  %v5040_v47 = vcombine.low %v1342_v7, %v1352_v25  ;;  %v1665_v22 = vrot.slane %v1664_v14, 4  ;;  %v1669_v37 = vrot.slane %v1667_v32, 5  ;;  %v3551_v11 = vrot.slane %v4734_v31, 9  ;;  %v6327_v25 = vld [vmem:[#allocation10_spill] sm:$0xff] }
  0xa0   : > { %3952 = vmatprep.mubr.msk.bf16.mxu0 %vm374_vm3, %v4983_v26  ;;  %v1660_v20 = vsel %vm4486_vm7, %v1655_v54, %v1659_v63  ;;  %v2746_v43 = vrot.slane %v5055_v18, 5  ;;  %v2745_v56 = vrot.slane %v2743_v24, 4  ;;  %v3485_v60 = vrot.slane %v6322_v15, 9 }
  0xa1   : > { %3915 = vmatmul.mubr.msk.bf16.gmra.mxu1 %vm374_vm3, %v4639_v34  ;;  %v1670_v51 = vsel %vm4486_vm7, %v1665_v22, %v1669_v37  ;;  %v2140_v63 = vrot.slane %v2138_v62, 4  ;;  %v2141_v46 = vrot.slane %v4715_v55, 5  ;;  %v5067_v42 = vsel %vm4362_vm4, %v3551_v11, %v2743_v24  ;;  %v6326_v55 = vld [vmem:[#allocation8_spill] sm:$0xff]  ;;  %v6328_v37 = vld [vmem:[#allocation7_spill] sm:$0xff] }
  0xa2   : > { %3918 = vmatprep.mubr.msk.bf16.mxu1 %vm374_vm3, %v4981_v38  ;;  %v5061_v29 = vcombine.low %v1660_v20, %v1670_v51  ;;  %v5071_v39 = vsel %vm4362_vm4, %v2745_v56, %v2746_v43  ;;  %v6325_v16 = vcombine.low %v6323_v12, %v6324_v57  ;;  %v2145_v14 = vrot.slane %v6326_v55, 5  ;;  %v6329_v51 = vld [vmem:[#allocation20_spill] sm:$0xff]  ;;  %v6330_v43 = vld [vmem:[#allocation9_spill] sm:$0xff] }
  0xa3   : > { %v3553_v23 = vcombine.low %v5067_v42, %v5071_v39  ;;  %v2139_v32 = vsel %vm4362_vm4, %v3485_v60, %v2138_v62  ;;  %v2142_v7 = vsel %vm4362_vm4, %v2140_v63, %v2141_v46  ;;  %v2152_v54 = vrot.slane %v6327_v25, 5  ;;  %v6331_v60 = vld [vmem:[#allocation18_spill] sm:$0xff]  ;;  %v6332_v46 = vld [vmem:[#allocation12_spill] sm:$0xff] }
  0xa4   : > { %v5091_v22 = vcombine.low %v2139_v32, %v2142_v7  ;;  %v3486_v24 = vrot.slane %v6328_v37, 9  ;;  %v2147_v20 = vrot.slane %v2145_v14, 4  ;;  %v2148_v36 = vrot.slane %v6329_v51, 5 }
  0xa5   : > { %v2757_v11 = vsel %vm423_vm0, %v4832_v17, 0  ;;  %v3487_v62 = vrot.slane %v6330_v43, 9  ;;  %v2154_v56 = vrot.slane %v2152_v54, 4  ;;  %v2155_v15 = vrot.slane %v4766_v9, 5 }
  0xa6   : > { %v2146_v63 = vsel %vm4362_vm4, %v3486_v24, %v2145_v14  ;;  %v2149_v17 = vsel %vm4362_vm4, %v2147_v20, %v2148_v36  ;;  %v2159_v12 = vrot.slane %v6332_v46, 5  ;;  %v2166_v57 = vrot.slane %v4503_v53, 5  ;;  %v6333_v14 = vld [vmem:[#allocation11_spill] sm:$0xff] }
  0xa7   : > { %3953 = vmatmul.mubr.msk.bf16.gmra.mxu0 %vm374_vm3, %v5014_v19  ;;  %v2153_v9 = vsel %vm4362_vm4, %v3487_v62, %v2152_v54  ;;  %v3488_v32 = vrot.slane %v6333_v14, 9  ;;  %v3489_v25 = vrot.slane %v4500_v52, 9  ;;  %v2169_v37 = vrot.slane %v4818_v41, 5  ;;  %v4175_v14 = vld [vmem:[%s4350_s13 + $0x94] sm:$0xf] }
  0xa8   : > { %3956 = vmatprep.mubr.msk.bf16.mxu0 %vm374_vm3, %v5016_v0  ;;  %v2161_v7 = vrot.slane %v2159_v12, 4  ;;  %v2168_v54 = vrot.slane %v2166_v57, 4  ;;  %v2173_v24 = vrot.slane %v4521_v58, 5  ;;  %v2180_v41 = vrot.slane %v4553_v4, 5  ;;  %v6334_v58 = vld [vmem:[#allocation13_spill] sm:$0xff] }
  0xa9   : > { %3919 = vmatmul.mubr.msk.bf16.gmra.mxu1 %vm374_vm3, %v4983_v26  ;;  %v2160_v53 = vsel %vm4362_vm4, %v3488_v32, %v2159_v12  ;;  %v2167_v52 = vsel %vm4362_vm4, %v3489_v25, %v2166_v57  ;;  %v3490_v36 = vrot.slane %v6334_v58, 9  ;;  %v3491_v43 = vrot.slane %v4550_v3, 9 }
  0xaa   : > { %3922 = vmatprep.mubr.msk.bf16.mxu1 %vm374_vm3, %v5014_v19  ;;  %v2182_v62 = vrot.slane %v2180_v41, 4  ;;  %v2197_v12 = vrot.slane %v4904_v27, 5  ;;  %v2208_v27 = vrot.slane %v4175_v14, 5 }
  0xab   : > { %v2174_v4 = vsel %vm4362_vm4, %v3490_v36, %v2173_v24  ;;  %v2181_v3 = vsel %vm4362_vm4, %v3491_v43, %v2180_v41 }
  0xaf   : > { %3957 = vmatmul.mubr.msk.bf16.gmra.mxu0 %vm374_vm3, %v5038_v5 }
  0xb0   : > { %3960 = vmatprep.mubr.msk.bf16.mxu0 %vm374_vm3, %v5040_v47 }
  0xb1   : > { %3923 = vmatmul.mubr.msk.bf16.gmra.mxu1 %vm374_vm3, %v5016_v0 }
  0xb2   : > { %3926 = vmatprep.mubr.msk.bf16.mxu1 %vm374_vm3, %v5038_v5 }
  0xb7   : > { %3961 = vmatmul.mubr.msk.bf16.gmra.mxu0 %vm374_vm3, %v5061_v29 }
  0xb8   : > { %4000 = vmatprep.mubr.msk.bf16.mxu0 %vm374_vm3, %v6325_v16  ;;  %v5119_v16 = vcombine.low %v2146_v63, %v2149_v17  ;;  %v4173_v17 = vld [vmem:[%s4350_s13 + $0x78] sm:$0xf] }
  0xb9   : > { %3927 = vmatmul.mubr.msk.bf16.gmra.mxu1 %vm374_vm3, %v5040_v47  ;;  %v3493_v46 = vrot.slane %v4173_v17, 9 }
  0xba   : > { %3966 = vmatprep.mubr.msk.bf16.mxu1 %vm374_vm3, %v4807_v35  ;;  %v2545_v35 = vsel %vm423_vm0, %v4853_v21, 0  ;;  %v2156_v21 = vsel %vm4362_vm4, %v2154_v56, %v2155_v15  ;;  %v2183_v56 = vrot.slane %v4861_v10, 5  ;;  %v4172_v10 = vld [vmem:[%s4350_s13 + $0x7c] sm:$0xf] }
  0xbb   : > { %v5121_v55 = vcombine.low %v2153_v9, %v2156_v21  ;;  %v2194_v15 = vrot.slane %v4172_v10, 5  ;;  %v4174_v9 = vld [vmem:[%s4350_s13 + $0x88] sm:$0xf] }
  0xbc   : > { %v2201_v21 = vrot.slane %v4174_v9, 5 }
  0xbe   : > { %v2203_v25 = vrot.slane %v2201_v21, 4 }
  0xbf   : > { %4001 = vmatmul.mubr.msk.bf16.vlgmr.msra.gmra.mxu0 %vm374_vm3, %v6331_v60 }
  0xc0   : > { %4067 = vmatpush3.bf16.msra.mxu0 %v2757_v11  ;;  %4004 = vmatprep.mubr.msk.bf16.mxu0 %vm374_vm3, %v5091_v22  ;;  %v2175_v11 = vrot.slane %v2173_v24, 4 }
  0xc1   : > { %3967 = vmatmul.mubr.msk.bf16.vlgmr.msra.gmra.mxu1 %vm374_vm3, %v4811_v1  ;;  %v2162_v1 = vrot.slane %v4780_v45, 5  ;;  %v2170_v45 = vsel %vm4362_vm4, %v2168_v54, %v2169_v37  ;;  %v2204_v54 = vrot.slane %v4913_v61, 5 }
  0xc2   : > { %4033 = vmatpush3.bf16.msra.mxu1 %v2545_v35  ;;  %3970 = vmatprep.mubr.msk.bf16.mxu1 %vm374_vm3, %v4870_v50  ;;  %v5147_v51 = vcombine.low %v2167_v52, %v2170_v45  ;;  %v6335_v52 = vld [vmem:[#allocation21_spill] sm:$0xff]  ;;  %v4178_v45 = vld [vmem:[%s4350_s13 + $0xa0] sm:$0xf] }
  0xc3   : > { %v2163_v50 = vsel %vm4362_vm4, %v2161_v7, %v2162_v1  ;;  %v4176_v7 = vld [vmem:[%s4350_s13 + $0x84] sm:$0xf]  ;;  %v2205_v61 = vsel %vm4362_vm4, %v2203_v25, %v2204_v54  ;;  %v2215_v41 = vrot.slane %v4178_v45, 5 }
  0xc4   : > { %v5145_v20 = vcombine.low %v2160_v53, %v2163_v50  ;;  %v3494_v1 = vrot.slane %v4176_v7, 9  ;;  %v2210_v53 = vrot.slane %v2208_v27, 4  ;;  %v2211_v50 = vrot.slane %v4945_v40, 5 }
  0xc7   : > { %4005 = vmatmul.mubr.msk.bf16.gmra.mxu0 %vm374_vm3, %v5119_v16 }
  0xc8   : > { %4008 = vmatprep.mubr.msk.bf16.mxu0 %vm374_vm3, %v5121_v55 }
  0xc9   : > { %3971 = vmatmul.mubr.msk.bf16.gmra.mxu1 %vm374_vm3, %v4875_v6  ;;  %v2176_v6 = vrot.slane %v4821_v28, 5  ;;  %v2184_v28 = vsel %vm4362_vm4, %v2182_v62, %v2183_v56  ;;  %v1876_v62 = vshrl.u32 %v4734_v31, 16  ;;  %v1879_v56 = vshll.u32 %v4734_v31, 16 }
  0xca   : > { %3974 = vmatprep.mubr.msk.bf16.mxu1 %vm374_vm3, %v4908_v30  ;;  %v5172_v63 = vcombine.low %v2181_v3, %v2184_v28 }
  0xcb   : > { %v2177_v30 = vsel %vm4362_vm4, %v2175_v11, %v2176_v6  ;;  %v2212_v11 = vsel %vm4362_vm4, %v2210_v53, %v2211_v50  ;;  %v4179_v6 = vld [vmem:[%s4350_s13 + $0xac] sm:$0xf]  ;;  %v1881_v14 = vrot.slane %v1879_v56, 5  ;;  %v4183_v56 = vld [vmem:[%s4350_s13 + $0xb4] sm:$0xf] }
  0xcc   : > { %v5170_v35 = vcombine.low %v2174_v4, %v2177_v30  ;;  %v2222_v43 = vrot.slane %v4179_v6, 5  ;;  %v1889_v4 = vshrl.u32 %v4737_v59, 16 }
  0xce   : > { %v1891_v7 = vrot.slane %v1889_v4, 4 }
  0xcf   : > { %4009 = vmatmul.mubr.msk.bf16.gmra.mxu0 %vm374_vm3, %v5145_v20 }
  0xd0   : > { %4012 = vmatprep.mubr.msk.bf16.mxu0 %vm374_vm3, %v5147_v51 }
  0xd1   : > { %3975 = vmatmul.mubr.msk.bf16.gmra.mxu1 %vm374_vm3, %v4910_v49  ;;  %v2196_v49 = vrot.slane %v2194_v15, 4 }
  0xd2   : > { %3978 = vmatprep.mubr.msk.bf16.mxu1 %vm374_vm3, %v4940_v2  ;;  %v2195_v2 = vsel %vm4362_vm4, %v3493_v46, %v2194_v15  ;;  %v4180_v15 = vld [vmem:[%s4350_s13 + $0x9c] sm:$0xf]  ;;  %v2217_v46 = vrot.slane %v2215_v41, 4 }
  0xd3   : > { %v2198_v57 = vsel %vm4362_vm4, %v2196_v49, %v2197_v12  ;;  %v3496_v17 = vrot.slane %v4180_v15, 9  ;;  %v6336_v49 = vld [vmem:[#allocation22_spill] sm:$0xff] }
  0xd4   : > { %v5190_v32 = vcombine.low %v2195_v2, %v2198_v57  ;;  %v2218_v31 = vrot.slane %v6336_v49, 5  ;;  %v2225_v2 = vrot.slane %v4986_v33, 5  ;;  %v1878_v57 = vrot.slane %v1876_v62, 4 }
  0xd5   : > { %v2216_v54 = vsel %vm4362_vm4, %v3496_v17, %v2215_v41 }
  0xd6   : > { %v2219_v33 = vsel %vm4362_vm4, %v2217_v46, %v2218_v31  ;;  %v1882_v45 = vor.u32 %v1881_v14, %v1878_v57 }
  0xd7   : > { %4013 = vmatmul.mubr.msk.bf16.gmra.mxu0 %vm374_vm3, %v5170_v35 }
  0xd8   : > { %4016 = vmatprep.mubr.msk.bf16.mxu0 %vm374_vm3, %v5172_v63  ;;  %v1883_v17 = vrot.slane %v1882_v45, 4 }
  0xd9   : > { %3979 = vmatmul.mubr.msk.bf16.gmra.mxu1 %vm374_vm3, %v4639_v34  ;;  %v4177_v34 = vld [vmem:[%s4350_s13 + $0x90] sm:$0xf] }
  0xda   : > { %3982 = vmatprep.mubr.msk.bf16.mxu1 %vm374_vm3, %v4981_v38  ;;  %v3495_v37 = vrot.slane %v4177_v34, 9  ;;  %v2202_v38 = vsel %vm4362_vm4, %v3494_v1, %v2201_v21  ;;  %v2224_v21 = vrot.slane %v2222_v43, 4  ;;  %v4182_v34 = vld [vmem:[%s4350_s13 + $0xb8] sm:$0xf] }
  0xdb   : > { %v5228_v28 = vcombine.low %v2202_v38, %v2205_v61 }
  0xdc   : > { %v2209_v36 = vsel %vm4362_vm4, %v3495_v37, %v2208_v27  ;;  %v2229_v37 = vrot.slane %v4182_v34, 5  ;;  %v2226_v61 = vsel %vm4362_vm4, %v2224_v21, %v2225_v2 }
  0xdd   : > { %v5230_v10 = vcombine.low %v2209_v36, %v2212_v11  ;;  %v1895_v36 = vshll.u32 %v5055_v18, 16 }
  0xde   : > { %v2231_v4 = vrot.slane %v2229_v37, 4 }
  0xdf   : > { %v5196_v24 = vpop.f32.mrf.mxu0  ;;  %4017 = vmatmul.mubr.msk.bf16.gmra.mxu0 %vm374_vm3, %v6335_v52  ;;  %v1897_v18 = vrot.slane %v1895_v36, 5 }
  0xe0   : > { %4020 = vmatprep.mubr.msk.bf16.mxu0 %vm374_vm3, %v5190_v32  ;;  %v5207_v58 = vpop.f32.mrf.mxu1 }
  0xe1   : > { %3983 = vmatmul.mubr.msk.bf16.gmra.mxu1 %vm374_vm3, %v4983_v26  ;;  %v5211_v40 = vpop.f32.mrf.mxu0  ;;  %v1885_v26 = vshll.u32 %v4737_v59, 16 }
  0xe2   : > { %3986 = vmatprep.mubr.msk.bf16.mxu1 %vm374_vm3, %v5014_v19  ;;  %v5224_v30 = vpop.f32.mrf.mxu1  ;;  %v4181_v19 = vld [vmem:[%s4350_s13 + $0xa8] sm:$0xf] }
  0xe3   : > { %v5226_v3 = vpop.f32.mrf.mxu0  ;;  %v3497_v59 = vrot.slane %v4181_v19, 9  ;;  %v1887_v27 = vrot.slane %v1885_v26, 5  ;;  %v2232_v26 = vrot.slane %v4992_v44, 5 }
  0xe4   : > { %v5234_v12 = vpop.f32.mrf.mxu1 }
  0xe5   : > { %v5236_v9 = vpop.f32.mrf.mxu0  ;;  %v2223_v38 = vsel %vm4362_vm4, %v3497_v59, %v2222_v43  ;;  %v1892_v41 = vor.u32 %v1891_v7, %v1887_v27  ;;  %v3498_v43 = vrot.slane %v4183_v56, 9  ;;  %v2233_v19 = vsel %vm4362_vm4, %v2231_v4, %v2232_v26 }
  0xe6   : > { %v5240_v1 = vpop.f32.mrf.mxu1  ;;  %v5272_v62 = vcombine.low %v2223_v38, %v2226_v61  ;;  %v1888_v2 = vsel %vm4486_vm7, %v1883_v17, %v1887_v27 }
  0xe7   : > { %v5242_v25 = vpop.f32.mrf.mxu0  ;;  %4021 = vmatmul.mubr.msk.bf16.gmra.mxu0 %vm374_vm3, %v5228_v28  ;;  %v1893_v46 = vrot.slane %v1892_v41, 4  ;;  %v2230_v44 = vsel %vm4362_vm4, %v3498_v43, %v2229_v37 }
  0xe8   : > { %4024 = vmatprep.mubr.msk.bf16.mxu0 %vm374_vm3, %v5230_v10  ;;  %v5253_v53 = vpop.f32.mrf.mxu1 }
  0xe9   : > { %3987 = vmatmul.mubr.msk.bf16.gmra.mxu1 %vm374_vm3, %v5016_v0  ;;  %v5257_v50 = vpop.f32.mrf.mxu0  ;;  %v5270_v0 = vcombine.low %v2216_v54, %v2219_v33  ;;  %v1898_v57 = vsel %vm4486_vm7, %v1893_v46, %v1897_v18  ;;  %v5308_v54 = vcombine.low %v2230_v44, %v2233_v19 }
  0xea   : > { %3990 = vmatprep.mubr.msk.bf16.mxu1 %vm374_vm3, %v5038_v5  ;;  %v5266_v11 = vpop.f32.mrf.mxu1  ;;  %v3466_v34 = vcombine.low %v1888_v2, %v1898_v57 }
  0xeb   : > { %v5268_v6 = vpop.f32.mrf.mxu0 }
  0xec   : > { %v5276_v15 = vpop.f32.mrf.mxu1 }
  0xed   : > { %v5278_v5 = vpop.f32.mrf.mxu0 }
  0xee   : > { %v5280_v49 = vpop.f32.mrf.mxu1 }
  0xef   : > { %v5282_v31 = vpop.f32.mrf.mxu0  ;;  %4025 = vmatmul.mubr.msk.bf16.gmra.mxu0 %vm374_vm3, %v5270_v0 }
  0xf0   : > { %4028 = vmatprep.mubr.msk.bf16.mxu0 %vm374_vm3, %v5272_v62  ;;  %v5292_v59 = vpop.f32.mrf.mxu1 }
  0xf1   : > { %3991 = vmatmul.mubr.msk.bf16.gmra.mxu1 %vm374_vm3, %v5040_v47  ;;  %v5296_v21 = vpop.f32.mrf.mxu0 }
  0xf2   : > { %3994 = vmatprep.mubr.msk.bf16.mxu1 %vm374_vm3, %v5061_v29  ;;  %v5304_v14 = vpop.f32.mrf.mxu1 }
  0xf3   : > { %v5306_v7 = vpop.f32.mrf.mxu0 }
  0xf4   : > { %v5310_v33 = vpop.f32.mrf.mxu1 }
  0xf5   : > { %v5312_v47 = vpop.f32.mrf.mxu0 }
  0xf6   : > { %v5314_v37 = vpop.f32.mrf.mxu1 }
  0xf7   : > { %v5316_v29 = vpop.f32.mrf.mxu0  ;;  %4029 = vmatmul.mubr.msk.bf16.gmra.mxu0 %vm374_vm3, %v5308_v54 }
  0xf8   : > { %4068 = vmatprep.mubr.msk.bf16.mxu0 %vm374_vm3, %v5091_v22  ;;  %v5322_v48 = vpop.f32.mrf.mxu1 }
  0xf9   : > { %3995 = vmatmul.mubr.msk.bf16.gmra.mxu1 %vm374_vm3, %v3466_v34  ;;  %v5325_v27 = vpop.f32.mrf.mxu0 }
  0xfa   : > { %4034 = vmatprep.mubr.msk.bf16.mxu1 %vm374_vm3, %v6331_v60  ;;  %v5329_v38 = vpop.f32.mrf.mxu1 }
  0xfb   : > { %v5331_v61 = vpop.f32.mrf.mxu0 }
  0xfc   : > { %v5333_v45 = vpop.f32.mrf.mxu1 }
  0xfd   : > { %v5335_v41 = vpop.f32.mrf.mxu0 }
  0xfe   : > { %v5337_v36 = vpop.f32.mrf.mxu1 }
  0xff   : > { %v3866_v56 = vpop.f32.mrf.mxu0  ;;  %4069 = vmatmul.mubr.msk.bf16.vlgmr.msra.gmra.mxu0 %vm374_vm3, %v5119_v16 }
 0x100   : > { %4072 = vmatprep.mubr.msk.bf16.mxu0 %vm374_vm3, %v5121_v55 }
 0x101   : > { %v3832_v43 = vpop.f32.mrf.mxu1  ;;  %4035 = vmatmul.mubr.msk.bf16.vlgmr.msra.gmra.mxu1 %vm374_vm3, %v5091_v22  ;;  %v807_v60 = vpop.f32.mrf.mxu0 }
 0x102   : > { %v642_v4 = vadd.f32 %v3832_v43, %v5196_v24  ;;  %4038 = vmatprep.mubr.msk.bf16.mxu1 %vm374_vm3, %v5119_v16 }
 0x103   : > { %v633_v26 = vpop.f32.mrf.mxu1  ;;  %v3867_v17 = vpop.f32.mrf.mxu0 }
 0x104   : > { %v5348_v46 = vadd.f32 %v3866_v56, %v642_v4  ;;  %v634_v18 = vadd.f32 %v633_v26, %v5211_v40 }
 0x105   : > { %v3833_v44 = vpop.f32.mrf.mxu1  ;;  %v810_v19 = vpop.f32.mrf.mxu0 }
 0x106   : > { %v5351_v2 = vadd.f32 %v807_v60, %v634_v18  ;;  %v645_v57 = vadd.f32 %v3833_v44, %v5226_v3 }
 0x107   : > { %v636_v34 = vpop.f32.mrf.mxu1  ;;  %v3870_v22 = vpop.f32.mrf.mxu0  ;;  %4073 = vmatmul.mubr.msk.bf16.gmra.mxu0 %vm374_vm3, %v5145_v20 }
 0x108   : > { %v5356_v24 = vadd.f32 %v3867_v17, %v645_v57  ;;  %v637_v16 = vadd.f32 %v636_v34, %v5236_v9  ;;  %4076 = vmatprep.mubr.msk.bf16.mxu0 %vm374_vm3, %v5147_v51 }
 0x109   : > { %v3836_v56 = vpop.f32.mrf.mxu1  ;;  %4039 = vmatmul.mubr.msk.bf16.gmra.mxu1 %vm374_vm3, %v5121_v55  ;;  %v823_v40 = vpop.f32.mrf.mxu0 }
 0x10a   : > { %v5363_v43 = vadd.f32 %v810_v19, %v637_v16  ;;  %v658_v3 = vadd.f32 %v3836_v56, %v5242_v25  ;;  %4042 = vmatprep.mubr.msk.bf16.mxu1 %vm374_vm3, %v5145_v20 }
 0x10b   : > { %v649_v60 = vpop.f32.mrf.mxu1  ;;  %v3871_v4 = vpop.f32.mrf.mxu0 }
 0x10c   : > { %v5368_v26 = vadd.f32 %v3870_v22, %v658_v3  ;;  %v650_v9 = vadd.f32 %v649_v60, %v5257_v50 }
 0x10d   : > { %v3837_v17 = vpop.f32.mrf.mxu1  ;;  %v826_v18 = vpop.f32.mrf.mxu0 }
 0x10e   : > { %v5371_v44 = vadd.f32 %v823_v40, %v650_v9  ;;  %v661_v55 = vadd.f32 %v3837_v17, %v5268_v6 }
 0x10f   : > { %v652_v57 = vpop.f32.mrf.mxu1  ;;  %v3874_v19 = vpop.f32.mrf.mxu0  ;;  %4077 = vmatmul.mubr.msk.bf16.gmra.mxu0 %vm374_vm3, %v5170_v35 }
 0x110   : > { %v5376_v25 = vadd.f32 %v3871_v4, %v661_v55  ;;  %v653_v20 = vadd.f32 %v652_v57, %v5278_v5  ;;  %4080 = vmatprep.mubr.msk.bf16.mxu0 %vm374_vm3, %v5172_v63 }
 0x111   : > { %v3840_v34 = vpop.f32.mrf.mxu1  ;;  %4043 = vmatmul.mubr.msk.bf16.gmra.mxu1 %vm374_vm3, %v5147_v51  ;;  %v839_v50 = vpop.f32.mrf.mxu0 }
 0x112   : > { %v5383_v22 = vadd.f32 %v826_v18, %v653_v20  ;;  %v674_v6 = vadd.f32 %v3840_v34, %v5282_v31  ;;  %4046 = vmatprep.mubr.msk.bf16.mxu1 %vm374_vm3, %v5170_v35 }
 0x113   : > { %v665_v16 = vpop.f32.mrf.mxu1  ;;  %v3875_v56 = vpop.f32.mrf.mxu0 }
 0x114   : > { %v5388_v40 = vadd.f32 %v3874_v19, %v674_v6  ;;  %v666_v5 = vadd.f32 %v665_v16, %v5296_v21 }
 0x115   : > { %v3841_v3 = vpop.f32.mrf.mxu1  ;;  %v842_v60 = vpop.f32.mrf.mxu0 }
 0x116   : > { %v5391_v4 = vadd.f32 %v839_v50, %v666_v5  ;;  %v677_v51 = vadd.f32 %v3841_v3, %v5306_v7  ;;  %v4184_v3 = vld [vmem:[%s4350_s13 + $0xc4] sm:$0xf] }
 0x117   : > { %v668_v9 = vpop.f32.mrf.mxu1  ;;  %v3878_v17 = vpop.f32.mrf.mxu0  ;;  %4081 = vmatmul.mubr.msk.bf16.gmra.mxu0 %vm374_vm3, %v6335_v52 }
 0x118   : > { %v5396_v31 = vadd.f32 %v3875_v56, %v677_v51  ;;  %v669_v35 = vadd.f32 %v668_v9, %v5312_v47  ;;  %4084 = vmatprep.mubr.msk.bf16.mxu0 %vm374_vm3, %v5190_v32 }
 0x119   : > { %v3844_v18 = vpop.f32.mrf.mxu1  ;;  %4047 = vmatmul.mubr.msk.bf16.gmra.mxu1 %vm374_vm3, %v5172_v63  ;;  %v855_v21 = vpop.f32.mrf.mxu0 }
 0x11a   : > { %v5403_v55 = vadd.f32 %v842_v60, %v669_v35  ;;  %v690_v7 = vadd.f32 %v3844_v18, %v5316_v29  ;;  %4050 = vmatprep.mubr.msk.bf16.mxu1 %vm374_vm3, %v6335_v52 }
 0x11b   : > { %v681_v57 = vpop.f32.mrf.mxu1  ;;  %v3879_v19 = vpop.f32.mrf.mxu0 }
 0x11c   : > { %v5408_v20 = vadd.f32 %v3878_v17, %v690_v7  ;;  %v682_v47 = vadd.f32 %v681_v57, %v5325_v27  ;;  %v4185_v7 = vld [vmem:[%s4350_s13 + $0xc0] sm:$0xf]  ;;  %s3343_s13 = sshll.u32 %s223_s12, 1 }
 0x11d   : > { %v3845_v34 = vpop.f32.mrf.mxu1  ;;  %v858_v50 = vpop.f32.mrf.mxu0  ;;  %s225_s15 = scalar_lea.vmem [#allocation2], %s3343_s13 }
 0x11e   : > { %v5411_v6 = vadd.f32 %v855_v21, %v682_v47  ;;  %v693_v63 = vadd.f32 %v3845_v34, %v5331_v61  ;;  %v2531_v61 = vrot.slane %v4184_v3, 5  ;;  %s3255_s16 = sshll.u32 %s225_s15, 4  ;;  %s3256_s16 = int_to_ptr.vmem [resolvable:$true] %s3255_s16 }
 0x11f   : > { %v684_v16 = vpop.f32.mrf.mxu1  ;;  %v3882_v56 = vpop.f32.mrf.mxu0  ;;  %4085 = vmatmul.mubr.msk.bf16.gmra.mxu0 %vm374_vm3, %v5228_v28  ;;  %s4186_s28 = scalar_lea.vmem %s3256_s16, 32  ;;  %p4193_p0 = scmp.lt.s32.totalorder %s3256_s16, %s4191_s29 }
 0x120   : > { %v5416_v29 = vadd.f32 %v3879_v19, %v693_v63  ;;  %v685_v52 = vadd.f32 %v684_v16, %v5335_v41  ;;  %4088 = vmatprep.mubr.msk.bf16.mxu0 %vm374_vm3, %v5230_v10  ;;  %v2533_v57 = vrot.slane %v2531_v61, 4  ;;  %v2534_v19 = vrot.slane %v5019_v13, 5  ;;  %p4187_p11 = scmp.ne.s32.totalorder %s3256_s16, %s4186_s28  ;;  %p4194_p1 = scmp.lt.s32.totalorder %s4192_s30, %s4186_s28 }
 0x121   : > { %v3848_v27 = vpop.f32.mrf.mxu1  ;;  %4051 = vmatmul.mubr.msk.bf16.gmra.mxu1 %vm374_vm3, %v5190_v32  ;;  %v871_v5 = vpop.f32.mrf.mxu0  ;;  %v3532_v32 = vrot.slane %v4185_v7, 9 }
 0x122   : > { %v5424_v60 = vadd.f32 %v858_v50, %v685_v52  ;;  %v706_v51 = vadd.f32 %v3848_v27, %v5207_v58  ;;  %4054 = vmatprep.mubr.msk.bf16.mxu1 %vm374_vm3, %v5228_v28  ;;  %v2535_v16 = vsel %vm4362_vm4, %v2533_v57, %v2534_v19  ;;  %p4188_p12 = pnand %p4187_p11, %p4318_p5  ;;  %p4195_p2 = por %p4194_p1, %p4193_p0 }
 0x123   : > { %v697_v9 = vpop.f32.mrf.mxu1  ;;  %v3883_v41 = vpop.f32.mrf.mxu0 }
 0x124   : > { %v5429_v17 = vadd.f32 %v3882_v56, %v706_v51  ;;  %v698_v35 = vadd.f32 %v697_v9, %v5224_v30  ;;  %p4189_p13 = pneg %p4188_p12 }
 0x125   : > { %v3849_v18 = vpop.f32.mrf.mxu1  ;;  %v874_v21 = vpop.f32.mrf.mxu0 }
 0x126   : > { %v5434_v47 = vadd.f32 %v871_v5, %v698_v35  ;;  %v709_v58 = vadd.f32 %v3849_v18, %v5234_v12  ;;  %v2532_v12 = vsel %vm4362_vm4, %v3532_v32, %v2531_v61  ;;  %p4196_p3 = pnand %p4195_p2, %p4189_p13 }
 0x127   : > { %v700_v34 = vpop.f32.mrf.mxu1  ;;  %v3886_v50 = vpop.f32.mrf.mxu0  ;;  %4089 = vmatmul.mubr.msk.bf16.gmra.mxu0 %vm374_vm3, %v5270_v0  ;;  %v3534_v3 = vcombine.low %v2532_v12, %v2535_v16 }
 0x128   : > { %v5439_v28 = vadd.f32 %v3883_v41, %v709_v58  ;;  %v701_v30 = vadd.f32 %v700_v34, %v5240_v1  ;;  %4092 = vmatprep.mubr.msk.bf16.mxu0 %vm374_vm3, %v5272_v62 }
 0x129   : > { %v3852_v63 = vpop.f32.mrf.mxu1  ;;  %4055 = vmatmul.mubr.msk.bf16.gmra.mxu1 %vm374_vm3, %v5230_v10  ;;  %v887_v13 = vpop.f32.mrf.mxu0 }
 0x12a   : > { %v5450_v56 = vadd.f32 %v874_v21, %v701_v30  ;;  %v722_v52 = vadd.f32 %v3852_v63, %v5253_v53  ;;  %4058 = vmatprep.mubr.msk.bf16.mxu1 %vm374_vm3, %v5270_v0 }
 0x12b   : > { %v713_v1 = vpop.f32.mrf.mxu1  ;;  %v3887_v27 = vpop.f32.mrf.mxu0 }
 0x12c   : > { %v5455_v5 = vadd.f32 %v3886_v50, %v722_v52  ;;  %v714_v10 = vadd.f32 %v713_v1, %v5266_v11 }
 0x12d   : > { %v3853_v51 = vpop.f32.mrf.mxu1  ;;  %v890_v9 = vpop.f32.mrf.mxu0 }
 0x12e   : > { %v5458_v61 = vadd.f32 %v887_v13, %v714_v10  ;;  %v725_v8 = vadd.f32 %v3853_v51, %v5276_v15 }
 0x12f   : > { %v716_v41 = vpop.f32.mrf.mxu1  ;;  %v3890_v35 = vpop.f32.mrf.mxu0  ;;  %4093 = vmatmul.mubr.msk.bf16.gmra.mxu0 %vm374_vm3, %v5308_v54 }
 0x130   : > { %v5463_v53 = vadd.f32 %v3887_v27, %v725_v8  ;;  %v717_v0 = vadd.f32 %v716_v41, %v5280_v49  ;;  %4096 = vmatprep.mubr.msk.bf16.mxu0 %vm374_vm3, %v3534_v3 }
 0x131   : > { %v3856_v18 = vpop.f32.mrf.mxu1  ;;  %4059 = vmatmul.mubr.msk.bf16.gmra.mxu1 %vm374_vm3, %v5272_v62  ;;  %v903_v11 = vpop.f32.mrf.mxu0 }
 0x132   : > { %v5469_v21 = vadd.f32 %v890_v9, %v717_v0  ;;  %v738_v15 = vadd.f32 %v3856_v18, %v5292_v59  ;;  %4062 = vmatprep.mubr.msk.bf16.mxu1 %vm374_vm3, %v5308_v54 }
 0x133   : > { %v729_v7 = vpop.f32.mrf.mxu1  ;;  %v3891_v32 = vpop.f32.mrf.mxu0 }
 0x134   : > { %v5474_v57 = vadd.f32 %v3890_v35, %v738_v15  ;;  %v730_v49 = vadd.f32 %v729_v7, %v5304_v14 }
 0x135   : > { %v3857_v19 = vpop.f32.mrf.mxu1  ;;  %v906_v58 = vpop.f32.mrf.mxu0 }
 0x136   : > { %v5477_v34 = vadd.f32 %v903_v11, %v730_v49  ;;  %v741_v62 = vadd.f32 %v3857_v19, %v5310_v33 }
 0x137   : > { %v732_v50 = vpop.f32.mrf.mxu1  ;;  %v3894_v30 = vpop.f32.mrf.mxu0  ;;  %4097 = vmatmul.mubr.msk.bf16.gmra.mxu0 %vm374_vm3, %v3553_v23 }
 0x138   : > { %v5484_v59 = vadd.f32 %v3891_v32, %v741_v62  ;;  %v733_v54 = vadd.f32 %v732_v50, %v5314_v37 }
 0x139   : > { %v3860_v63 = vpop.f32.mrf.mxu1  ;;  %4063 = vmatmul.mubr.msk.bf16.gmra.mxu1 %vm374_vm3, %v3534_v3  ;;  %v919_v14 = vpop.f32.mrf.mxu0 }
 0x13a   : > { %v5488_v13 = vadd.f32 %v906_v58, %v733_v54  ;;  %v754_v12 = vadd.f32 %v3860_v63, %v5322_v48 }
 0x13b   : > { %v745_v33 = vpop.f32.mrf.mxu1  ;;  %v3895_v16 = vpop.f32.mrf.mxu0 }
 0x13c   : > { %v5491_v52 = vadd.f32 %v3894_v30, %v754_v12  ;;  %v746_v42 = vadd.f32 %v745_v33, %v5329_v38 }
 0x13d   : > { %v3861_v39 = vpop.f32.mrf.mxu1  ;;  %v922_v23 = vpop.f32.mrf.mxu0 }
 0x13e   : > { %v5494_v1 = vadd.f32 %v919_v14, %v746_v42  ;;  %v757_v37 = vadd.f32 %v3861_v39, %v5333_v45 }
 0x13f   : > { %v748_v27 = vpop.f32.mrf.mxu1  ;;  %v3934_v10 = vpop.f32.mrf.mxu0 }
 0x140   : > { %v5497_v3 = vadd.f32 %v3895_v16, %v757_v37  ;;  %v749_v51 = vadd.f32 %v748_v27, %v5337_v36 }
 0x141   : > { %v3900_v9 = vpop.f32.mrf.mxu1  ;;  %v1716_v48 = vpop.f32.mrf.mxu0 }
 0x142   : > { %v5500_v8 = vadd.f32 %v922_v23, %v749_v51  ;;  %v1617_v41 = vadd.f32 %v3900_v9, %v5348_v46 }
 0x143   : > { %v1488_v35 = vpop.f32.mrf.mxu1  ;;  %v3935_v38 = vpop.f32.mrf.mxu0 }
 0x144   : > { %v5503_v0 = vadd.f32 %v3934_v10, %v1617_v41  ;;  %v1615_v18 = vadd.f32 %v1488_v35, %v5351_v2 }
 0x145   : > { %v3901_v11 = vpop.f32.mrf.mxu1  ;;  %v1719_v45 = vpop.f32.mrf.mxu0 }
 0x146   : > { %v5506_v15 = vadd.f32 %v1716_v48, %v1615_v18  ;;  %v1618_v7 = vadd.f32 %v3901_v11, %v5356_v24 }
 0x147   : > { %v1491_v32 = vpop.f32.mrf.mxu1  ;;  %v3938_v36 = vpop.f32.mrf.mxu0 }
 0x148   : > { %v5509_v49 = vadd.f32 %v3935_v38, %v1618_v7  ;;  %v1616_v19 = vadd.f32 %v1491_v32, %v5363_v43 }
 0x149   : > { %v3904_v58 = vpop.f32.mrf.mxu1  ;;  %v1732_v46 = vpop.f32.mrf.mxu0 }
 0x14a   : > { %v5512_v62 = vadd.f32 %v1719_v45, %v1616_v19  ;;  %v1621_v50 = vadd.f32 %v3904_v58, %v5368_v26 }
 0x14b   : > { %v1504_v30 = vpop.f32.mrf.mxu1  ;;  %v3939_v2 = vpop.f32.mrf.mxu0 }
 0x14c   : > { %v5515_v54 = vadd.f32 %v3938_v36, %v1621_v50  ;;  %v1619_v63 = vadd.f32 %v1504_v30, %v5371_v44 }
 0x14d   : > { %v3905_v14 = vpop.f32.mrf.mxu1  ;;  %v1735_v24 = vpop.f32.mrf.mxu0 }
 0x14e   : > { %v5518_v12 = vadd.f32 %v1732_v46, %v1619_v63  ;;  %v1622_v33 = vadd.f32 %v3905_v14, %v5376_v25 }
 0x14f   : > { %v1507_v16 = vpop.f32.mrf.mxu1  ;;  %v3942_v43 = vpop.f32.mrf.mxu0 }
 0x150   : > { %v5521_v42 = vadd.f32 %v3939_v2, %v1622_v33  ;;  %v1620_v39 = vadd.f32 %v1507_v16, %v5383_v22 }
 0x151   : > { %v3908_v23 = vpop.f32.mrf.mxu1  ;;  %v1748_v26 = vpop.f32.mrf.mxu0 }
 0x152   : > { %v5524_v37 = vadd.f32 %v1735_v24, %v1620_v39  ;;  %v1625_v27 = vadd.f32 %v3908_v23, %v5388_v40 }
 0x153   : > { %v1520_v10 = vpop.f32.mrf.mxu1  ;;  %v3943_v44 = vpop.f32.mrf.mxu0 }
 0x154   : > { %v5527_v51 = vadd.f32 %v3942_v43, %v1625_v27  ;;  %v1623_v9 = vadd.f32 %v1520_v10, %v5391_v4 }
 0x155   : > { %v3909_v48 = vpop.f32.mrf.mxu1  ;;  %v1751_v25 = vpop.f32.mrf.mxu0 }
 0x156   : > { %v5530_v41 = vadd.f32 %v1748_v26, %v1623_v9  ;;  %v1626_v35 = vadd.f32 %v3909_v48, %v5396_v31 }
 0x157   : > { %v1523_v38 = vpop.f32.mrf.mxu1  ;;  %v3946_v22 = vpop.f32.mrf.mxu0 }
 0x158   : > { %v5533_v18 = vadd.f32 %v3943_v44, %v1626_v35  ;;  %v1624_v11 = vadd.f32 %v1523_v38, %v5403_v55 }
 0x159   : > { %v3912_v45 = vpop.f32.mrf.mxu1  ;;  %v1764_v40 = vpop.f32.mrf.mxu0 }
 0x15a   : > { %v5536_v7 = vadd.f32 %v1751_v25, %v1624_v11  ;;  %v1629_v32 = vadd.f32 %v3912_v45, %v5408_v20 }
 0x15b   : > { %v1536_v36 = vpop.f32.mrf.mxu1  ;;  %v3947_v4 = vpop.f32.mrf.mxu0 }
 0x15c   : > { %v5539_v19 = vadd.f32 %v3946_v22, %v1629_v32  ;;  %v1627_v58 = vadd.f32 %v1536_v36, %v5411_v6 }
 0x15d   : > { %v3913_v46 = vpop.f32.mrf.mxu1  ;;  %v1767_v31 = vpop.f32.mrf.mxu0 }
 0x15e   : > { %v5542_v50 = vadd.f32 %v1764_v40, %v1627_v58  ;;  %v1630_v30 = vadd.f32 %v3913_v46, %v5416_v29 }
 0x15f   : > { %v1539_v2 = vpop.f32.mrf.mxu1  ;;  %v3950_v55 = vpop.f32.mrf.mxu0 }
 0x160   : > { %v5545_v63 = vadd.f32 %v3947_v4, %v1630_v30  ;;  %v1628_v14 = vadd.f32 %v1539_v2, %v5424_v60 }
 0x161   : > { %v3916_v24 = vpop.f32.mrf.mxu1  ;;  %v1780_v20 = vpop.f32.mrf.mxu0 }
 0x162   : > { %v5548_v33 = vadd.f32 %v1767_v31, %v1628_v14  ;;  %v1633_v16 = vadd.f32 %v3916_v24, %v5429_v17 }
 0x163   : > { %v1552_v43 = vpop.f32.mrf.mxu1  ;;  %v3951_v6 = vpop.f32.mrf.mxu0 }
 0x164   : > { %v5551_v39 = vadd.f32 %v3950_v55, %v1633_v16  ;;  %v1631_v23 = vadd.f32 %v1552_v43, %v5434_v47 }
 0x165   : > { %v3917_v26 = vpop.f32.mrf.mxu1  ;;  %v1783_v29 = vpop.f32.mrf.mxu0 }
 0x166   : > { %v5554_v27 = vadd.f32 %v1780_v20, %v1631_v23  ;;  %v1634_v10 = vadd.f32 %v3917_v26, %v5439_v28 }
 0x167   : > { %v1555_v44 = vpop.f32.mrf.mxu1  ;;  %v3954_v60 = vpop.f32.mrf.mxu0 }
 0x168   : > { %v5557_v9 = vadd.f32 %v3951_v6, %v1634_v10  ;;  %v1632_v48 = vadd.f32 %v1555_v44, %v5450_v56 }
 0x169   : > { %v3920_v25 = vpop.f32.mrf.mxu1  ;;  %v1796_v17 = vpop.f32.mrf.mxu0 }
 0x16a   : > { %v5560_v35 = vadd.f32 %v1783_v29, %v1632_v48  ;;  %v1637_v38 = vadd.f32 %v3920_v25, %v5455_v5 }
 0x16b   : > { %v1568_v22 = vpop.f32.mrf.mxu1  ;;  %v3955_v47 = vpop.f32.mrf.mxu0 }
 0x16c   : > { %6337 = vst [vmem:[#allocation14_spill] sm:$0xff] %v5560_v35  ;;  %v5563_v11 = vadd.f32 %v3954_v60, %v1637_v38  ;;  %v1635_v45 = vadd.f32 %v1568_v22, %v5458_v61 }
 0x16d   : > { %v3921_v40 = vpop.f32.mrf.mxu1  ;;  %v1799_v28 = vpop.f32.mrf.mxu0 }
 0x16e   : > { %6338 = vst [vmem:[#allocation15_spill] sm:$0xff] %v5563_v11  ;;  %v5566_v32 = vadd.f32 %v1796_v17, %v1635_v45  ;;  %v1638_v36 = vadd.f32 %v3921_v40, %v5463_v53 }
 0x16f   : > { %v1571_v4 = vpop.f32.mrf.mxu1  ;;  %v3958_v56 = vpop.f32.mrf.mxu0 }
 0x170   : > { %6339 = vst [vmem:[#allocation16_spill] sm:$0xff] %v5566_v32  ;;  %v5569_v58 = vadd.f32 %v3955_v47, %v1638_v36  ;;  %v1636_v46 = vadd.f32 %v1571_v4, %v5469_v21 }
 0x171   : > { %v3924_v31 = vpop.f32.mrf.mxu1  ;;  %v1812_v5 = vpop.f32.mrf.mxu0 }
 0x172   : > { %6340 = vst [vmem:[#allocation6_spill] sm:$0xff] %v5569_v58  ;;  %v5572_v30 = vadd.f32 %v1799_v28, %v1636_v46  ;;  %v1641_v2 = vadd.f32 %v3924_v31, %v5474_v57 }
 0x173   : > { %v1584_v55 = vpop.f32.mrf.mxu1  ;;  %v3959_v61 = vpop.f32.mrf.mxu0 }
 0x174   : > { %6341 = vst [vmem:[#allocation5_spill] sm:$0xff] %v5572_v30  ;;  %v5575_v14 = vadd.f32 %v3958_v56, %v1641_v2  ;;  %v1639_v24 = vadd.f32 %v1584_v55, %v5477_v34 }
 0x175   : > { %v3925_v20 = vpop.f32.mrf.mxu1  ;;  %v1815_v53 = vpop.f32.mrf.mxu0 }
 0x176   : > { %6342 = vst [vmem:[#allocation17_spill] sm:$0xff] %v5575_v14  ;;  %v5578_v16 = vadd.f32 %v1812_v5, %v1639_v24  ;;  %v1642_v43 = vadd.f32 %v3925_v20, %v5484_v59 }
 0x177   : > { %v1587_v6 = vpop.f32.mrf.mxu1  ;;  %v3962_v21 = vpop.f32.mrf.mxu0 }
 0x178   : > { %6343 = vst [vmem:[#allocation19_spill] sm:$0xff] %v5578_v16  ;;  %v5581_v23 = vadd.f32 %v3959_v61, %v1642_v43  ;;  %v1640_v26 = vadd.f32 %v1587_v6, %v5488_v13 }
 0x179   : > { %v3928_v29 = vpop.f32.mrf.mxu1  ;;  %v1828_v57 = vpop.f32.mrf.mxu0 }
 0x17a   : > { %6344 = vst [vmem:[#allocation8_spill] sm:$0xff] %v5581_v23  ;;  %v5584_v10 = vadd.f32 %v1815_v53, %v1640_v26  ;;  %v1645_v44 = vadd.f32 %v3928_v29, %v5491_v52 }
 0x17b   : > { %v1600_v60 = vpop.f32.mrf.mxu1  ;;  %v3963_v34 = vpop.f32.mrf.mxu0 }
 0x17c   : > { %6345 = vst [vmem:[#allocation10_spill] sm:$0xff] %v5584_v10  ;;  %v5587_v48 = vadd.f32 %v3962_v21, %v1645_v44  ;;  %v1643_v25 = vadd.f32 %v1600_v60, %v5494_v1 }
 0x17d   : > { %v3929_v17 = vpop.f32.mrf.mxu1  ;;  %v1831_v59 = vpop.f32.mrf.mxu0 }
 0x17e   : > { %6346 = vst [vmem:[#allocation7_spill] sm:$0xff] %v5587_v48  ;;  %v5590_v38 = vadd.f32 %v1828_v57, %v1643_v25  ;;  %v1646_v22 = vadd.f32 %v3929_v17, %v5497_v3 }
 0x17f   : > { %v1603_v47 = vpop.f32.mrf.mxu1  ;;  %v5593_v13 = vpop.f32.mrf.mxu0 }
 0x180   : > { %6347 = vst [vmem:[#allocation20_spill] sm:$0xff] %v5590_v38  ;;  %v5595_v45 = vadd.f32 %v3963_v34, %v1646_v22  ;;  %v1644_v40 = vadd.f32 %v1603_v47, %v5500_v8 }
 0x181   : > { %v3968_v52 = vpop.f32.mrf.mxu1  ;;  %v5598_v28 = vpop.f32.mrf.mxu0 }
 0x182   : > { %6348 = vst [vmem:[#allocation9_spill] sm:$0xff] %v5595_v45  ;;  %v5600_v36 = vadd.f32 %v1831_v59, %v1644_v40 }
 0x183   : > { %v1944_v4 = vpop.f32.mrf.mxu1  ;;  %v5602_v1 = vpop.f32.mrf.mxu0 }
 0x184   : > { %6349 = vst [vmem:[#allocation18_spill] sm:$0xff] %v5600_v36 }
 0x185   : > { %v5604_v56 = vpop.f32.mrf.mxu1  ;;  %v5606_v46 = vpop.f32.mrf.mxu0 }
 0x187   : > { %v5608_v3 = vpop.f32.mrf.mxu1  ;;  %v5610_v31 = vpop.f32.mrf.mxu0 }
 0x189   : > { %v5612_v5 = vpop.f32.mrf.mxu1  ;;  %v5614_v2 = vpop.f32.mrf.mxu0 }
 0x18b   : > { %v5616_v8 = vpop.f32.mrf.mxu1  ;;  %v5618_v55 = vpop.f32.mrf.mxu0 }
 0x18d   : > { %v5620_v61 = vpop.f32.mrf.mxu1  ;;  %v5622_v24 = vpop.f32.mrf.mxu0 }
 0x18f   : > { %v5624_v20 = vpop.f32.mrf.mxu1  ;;  %v5626_v53 = vpop.f32.mrf.mxu0 }
 0x191   : > { %v5628_v43 = vpop.f32.mrf.mxu1  ;;  %v5630_v6 = vpop.f32.mrf.mxu0 }
 0x193   : > { %v5632_v21 = vpop.f32.mrf.mxu1  ;;  %v5634_v26 = vpop.f32.mrf.mxu0 }
 0x195   : > { %v5636_v29 = vpop.f32.mrf.mxu1  ;;  %v5638_v57 = vpop.f32.mrf.mxu0 }
 0x197   : > { %v5640_v44 = vpop.f32.mrf.mxu1  ;;  %v5642_v60 = vpop.f32.mrf.mxu0 }
 0x199   : > { %v5644_v34 = vpop.f32.mrf.mxu1  ;;  %v5646_v25 = vpop.f32.mrf.mxu0 }
 0x19b   : > { %v5648_v17 = vpop.f32.mrf.mxu1  ;;  %v5650_v59 = vpop.f32.mrf.mxu0 }
 0x19d   : > { %v5652_v22 = vpop.f32.mrf.mxu1  ;;  %v5654_v47 = vpop.f32.mrf.mxu0 }
 0x19f   : > { %v5656_v40 = vpop.f32.mrf.mxu1  ;;  %v5658_v36 = vpop.f32.mrf.mxu0 }
 0x1a0   : > { %6350 = vst [vmem:[#allocation12_spill] sm:$0xff] %v5658_v36 }
 0x1a1   : > { %v5660_v45 = vpop.f32.mrf.mxu1  ;;  %v5662_v38 = vpop.f32.mrf.mxu0 }
 0x1a2   : > { %6351 = vst [vmem:[#allocation11_spill] sm:$0xff] %v5662_v38 }
 0x1a3   : > { %v5664_v48 = vpop.f32.mrf.mxu1  ;;  %v5666_v10 = vpop.f32.mrf.mxu0 }
 0x1a4   : > { %6352 = vst [vmem:[#allocation13_spill] sm:$0xff] %v5666_v10 }
 0x1a5   : > { %v5668_v23 = vpop.f32.mrf.mxu1  ;;  %v5670_v16 = vpop.f32.mrf.mxu0 }
 0x1a6   : > { %6353 = vst [vmem:[#allocation21_spill] sm:$0xff] %v5668_v23  ;;  %6354 = vst [vmem:[#allocation22_spill] sm:$0xff] %v5670_v16 }
 0x1a7   : > { %v5672_v14 = vpop.f32.mrf.mxu1  ;;  %v5674_v30 = vpop.f32.mrf.mxu0 }
 0x1a8   : > { %6355 = vst [vmem:[#allocation23_spill] sm:$0xff] %v5672_v14  ;;  %6356 = vst [vmem:[#allocation24_spill] sm:$0xff] %v5674_v30 }
 0x1a9   : > { %v5676_v58 = vpop.f32.mrf.mxu1  ;;  %v5678_v32 = vpop.f32.mrf.mxu0 }
 0x1aa   : > { %6357 = vst [vmem:[#allocation25_spill] sm:$0xff] %v5676_v58  ;;  %6358 = vst [vmem:[#allocation26_spill] sm:$0xff] %v5678_v32 }
 0x1ab   : > { %v5680_v11 = vpop.f32.mrf.mxu1  ;;  %v5682_v35 = vpop.f32.mrf.mxu0 }
 0x1ac   : > { %6359 = vst [vmem:[#allocation27_spill] sm:$0xff] %v5680_v11  ;;  %6360 = vst [vmem:[#allocation28_spill] sm:$0xff] %v5682_v35 }
 0x1ad   : > { %v5684_v38 = vpop.f32.mrf.mxu1  ;;  %v5686_v36 = vpop.f32.mrf.mxu0 }
 0x1ae   : > { %6361 = vst [vmem:[#allocation29_spill] sm:$0xff] %v5684_v38  ;;  %6362 = vst [vmem:[#allocation30_spill] sm:$0xff] %v5686_v36 }
 0x1af   : > { %v5688_v10 = vpop.f32.mrf.mxu1  ;;  %v5690_v23 = vpop.f32.mrf.mxu0 }
 0x1b0   : > { %6363 = vst [vmem:[#allocation31_spill] sm:$0xff] %v5688_v10  ;;  %6364 = vst [vmem:[#allocation32_spill] sm:$0xff] %v5690_v23 }
 0x1b1   : > { %v5692_v16 = vpop.f32.mrf.mxu1  ;;  %v5694_v30 = vpop.f32.mrf.mxu0 }
 0x1b2   : > { %6365 = vst [vmem:[#allocation33_spill] sm:$0xff] %v5692_v16  ;;  %6366 = vst [vmem:[#allocation34_spill] sm:$0xff] %v5694_v30  ;;  %v2073_v30 = vadd.f32 %v3968_v52, %v5503_v0  ;;  %v2072_v0 = vadd.f32 %v5608_v3, %v5512_v62 }
 0x1b3   : > { %v5696_v58 = vpop.f32.mrf.mxu1  ;;  %v5698_v32 = vpop.f32.mrf.mxu0 }
 0x1b4   : > { %6367 = vst [vmem:[#allocation35_spill] sm:$0xff] %v5696_v58  ;;  %6368 = vst [vmem:[#allocation36_spill] sm:$0xff] %v5698_v32 }
 0x1b5   : > { %v5700_v11 = vpop.f32.mrf.mxu1  ;;  %v5702_v35 = vpop.f32.mrf.mxu0 }
 0x1b6   : > { %6369 = vst [vmem:[#allocation37_spill] sm:$0xff] %v5700_v11  ;;  %6370 = vst [vmem:[#allocation38_spill] sm:$0xff] %v5702_v35  ;;  %v2071_v35 = vadd.f32 %v1944_v4, %v5506_v15  ;;  %v2075_v4 = vadd.f32 %v5616_v8, %v5518_v12  ;;  %v2076_v8 = vadd.f32 %v5624_v20, %v5524_v37 }
 0x1b7   : > { %v5704_v38 = vpop.f32.mrf.mxu1  ;;  %v5706_v36 = vpop.f32.mrf.mxu0 }
 0x1b8   : > { %6371 = vst [vmem:[#allocation39_spill] sm:$0xff] %v5704_v38  ;;  %6372 = vst [vmem:[#allocation40_spill] sm:$0xff] %v5706_v36 }
 0x1b9   : > { %v5708_v10 = vpop.f32.mrf.mxu1  ;;  %v5710_v23 = vpop.f32.mrf.mxu0 }
 0x1ba   : > { %6373 = vst [vmem:[#allocation41_spill] sm:$0xff] %v5708_v10  ;;  %6374 = vst [vmem:[#allocation42_spill] sm:$0xff] %v5710_v23  ;;  %v2498_v10 = vadd.f32 %v5593_v13, %v2073_v30  ;;  %v2074_v23 = vadd.f32 %v5604_v56, %v5509_v49  ;;  %v2077_v13 = vadd.f32 %v5612_v5, %v5515_v54 }
 0x1bb   : > { %v5712_v16 = vpop.f32.mrf.mxu1  ;;  %v5714_v14 = vpop.f32.mrf.mxu0  ;;  %v2078_v54 = vadd.f32 %v5620_v61, %v5521_v42 }
 0x1bc   : > { %6375 = vst [vmem:[#allocation43_spill] sm:$0xff] %v5712_v16  ;;  %6376 = vst [vmem:[#allocation44_spill] sm:$0xff] %v5714_v14  ;;  %v2496_v14 = vadd.f32 %v5598_v28, %v2071_v35  ;;  %v2499_v49 = vadd.f32 %v5602_v1, %v2074_v23 }
 0x1bd   : > { %v5717_v58 = vpop.f32.mrf.mxu1  ;;  %v5719_v32 = vpop.f32.mrf.mxu0  ;;  %v2503_v61 = vadd.f32 %v5618_v55, %v2078_v54  ;;  %v2079_v55 = vadd.f32 %v5632_v21, %v5530_v41 }
 0x1bf   : > { %v5723_v38 = vpop.f32.mrf.mxu1  ;;  %v4070_v36 = vpop.f32.mrf.mxu0 }
 0x1c1   : > { %v4036_v16 = vpop.f32.mrf.mxu1  ;;  %v2793_v11 = vpop.f32.mrf.mxu0 }
 0x1c2   : > { %v2710_v52 = vadd.f32 %v4036_v16, %v2498_v10  ;;  %v2497_v10 = vadd.f32 %v5606_v46, %v2072_v0  ;;  %v2081_v0 = vadd.f32 %v5628_v43, %v5527_v51 }
 0x1c3   : > { %v2581_v15 = vpop.f32.mrf.mxu1  ;;  %v4071_v30 = vpop.f32.mrf.mxu0 }
 0x1c4   : > { %v5739_v35 = vadd.f32 %v4070_v36, %v2710_v52  ;;  %v2708_v28 = vadd.f32 %v2581_v15, %v2496_v14  ;;  %v2502_v14 = vadd.f32 %v5610_v31, %v2077_v13  ;;  %v2501_v13 = vadd.f32 %v5622_v24, %v2076_v8 }
 0x1c5   : > { %v4037_v62 = vpop.f32.mrf.mxu1  ;;  %v2796_v16 = vpop.f32.mrf.mxu0 }
 0x1c6   : > { %3607 = vst.msk [vmem:[%s5734_s9 + $0x31] sm:$0xff] %vm2952_vm8, %v5739_v35  ;;  %v5747_v56 = vadd.f32 %v2793_v11, %v2708_v28  ;;  %v2711_v23 = vadd.f32 %v4037_v62, %v2499_v49  ;;  %v2500_v11 = vadd.f32 %v5614_v2, %v2075_v4  ;;  %v2956_v28 = vsel %vm2952_vm8, %v5739_v35, 0.0 }
 0x1c7   : > { %v2584_v36 = vpop.f32.mrf.mxu1  ;;  %v4074_v1 = vpop.f32.mrf.mxu0 }
 0x1c8   : > { %3605 = vst.msk [vmem:[%s5734_s9 + $0x19] sm:$0xff] %vm2952_vm8, %v5747_v56  ;;  %v5755_v46 = vadd.f32 %v4071_v30, %v2711_v23  ;;  %v2709_v12 = vadd.f32 %v2584_v36, %v2497_v10  ;;  %v2953_v2 = vsel %vm2952_vm8, %v5747_v56, 0.0  ;;  %v2082_v10 = vadd.f32 %v5636_v29, %v5533_v18 }
 0x1c9   : > { %v4040_v3 = vpop.f32.mrf.mxu1  ;;  %v2809_v5 = vpop.f32.mrf.mxu0  ;;  %v2506_v23 = vadd.f32 %v5626_v53, %v2081_v0  ;;  %v2080_v29 = vadd.f32 %v5640_v44, %v5536_v7 }
 0x1ca   : > { %3608 = vst.msk [vmem:[%s5734_s9 + $0x39] sm:$0xff] %vm2952_vm8, %v5755_v46  ;;  %v5763_v42 = vadd.f32 %v2796_v16, %v2709_v12  ;;  %v2714_v31 = vadd.f32 %v4040_v3, %v2502_v14  ;;  %v2958_v24 = vsel %vm2952_vm8, %v5755_v46, 0.0 }
 0x1cb   : > { %v2597_v52 = vpop.f32.mrf.mxu1  ;;  %v4075_v15 = vpop.f32.mrf.mxu0 }
 0x1cc   : > { %v2954_v37 = vsel %vm2952_vm8, %v5763_v42, 0.0  ;;  %3606 = vst.msk [vmem:[%s5734_s9 + $0x21] sm:$0xff] %vm2952_vm8, %v5763_v42  ;;  %v5775_v20 = vadd.f32 %v4074_v1, %v2714_v31  ;;  %v2712_v30 = vadd.f32 %v2597_v52, %v2500_v11  ;;  %v2504_v1 = vadd.f32 %v5630_v6, %v2079_v55 }
 0x1cd   : > { %v2955_v49 = vadd.f32 %v2954_v37, %v2953_v2  ;;  %v4041_v51 = vpop.f32.mrf.mxu1  ;;  %v2812_v43 = vpop.f32.mrf.mxu0  ;;  %v2507_v11 = vadd.f32 %v5634_v26, %v2082_v10  ;;  %v2083_v52 = vadd.f32 %v5648_v17, %v5542_v50  ;;  %v2505_v37 = vadd.f32 %v5638_v57, %v2080_v29 }
 0x1ce   : > { %3611 = vst.msk [vmem:[%s5734_s9 + $0x61] sm:$0xff] %vm2952_vm8, %v5775_v20  ;;  %v5785_v62 = vadd.f32 %v2809_v5, %v2712_v30  ;;  %v2715_v16 = vadd.f32 %v4041_v51, %v2503_v61  ;;  %v2085_v61 = vadd.f32 %v5644_v34, %v5539_v19  ;;  %v2964_v19 = vsel %vm2952_vm8, %v5775_v20, 0.0 }
 0x1cf   : > { %v2957_v4 = vadd.f32 %v2956_v28, %v2955_v49  ;;  %v2600_v41 = vpop.f32.mrf.mxu1  ;;  %v4078_v21 = vpop.f32.mrf.mxu0  ;;  %v2086_v55 = vadd.f32 %v5652_v22, %v5545_v63  ;;  %v2508_v28 = vadd.f32 %v5646_v25, %v2083_v52  ;;  %v2084_v22 = vadd.f32 %v5656_v40, %v5548_v33 }
 0x1d0   : > { %3609 = vst.msk [vmem:[%s5734_s9 + $0x49] sm:$0xff] %vm2952_vm8, %v5785_v62  ;;  %v5795_v54 = vadd.f32 %v4075_v15, %v2715_v16  ;;  %v2713_v36 = vadd.f32 %v2600_v41, %v2501_v13  ;;  %v2960_v53 = vsel %vm2952_vm8, %v5785_v62, 0.0  ;;  %v2510_v51 = vadd.f32 %v5642_v60, %v2085_v61 }
 0x1d1   : > { %v2959_v14 = vadd.f32 %v2958_v24, %v2957_v4  ;;  %v4044_v12 = vpop.f32.mrf.mxu1  ;;  %v2825_v18 = vpop.f32.mrf.mxu0  ;;  %v2509_v29 = vadd.f32 %v5654_v47, %v2084_v22 }
 0x1d2   : > { %3612 = vst.msk [vmem:[%s5734_s9 + $0x69] sm:$0xff] %vm2952_vm8, %v5795_v54  ;;  %v5805_v3 = vadd.f32 %v2812_v43, %v2713_v36  ;;  %v2718_v5 = vadd.f32 %v4044_v12, %v2506_v23  ;;  %v2966_v57 = vsel %vm2952_vm8, %v5795_v54, 0.0  ;;  %v2089_v36 = vadd.f32 %v5660_v45, %v5551_v39 }
 0x1d3   : > { %v2961_v8 = vadd.f32 %v2960_v53, %v2959_v14  ;;  %v2613_v6 = vpop.f32.mrf.mxu1  ;;  %v4079_v31 = vpop.f32.mrf.mxu0  ;;  %v2087_v14 = vadd.f32 %v5664_v48, %v5554_v27 }
 0x1d4   : > { %v2962_v7 = vsel %vm2952_vm8, %v5805_v3, 0.0  ;;  %3610 = vst.msk [vmem:[%s5734_s9 + $0x51] sm:$0xff] %vm2952_vm8, %v5805_v3  ;;  %v5815_v44 = vadd.f32 %v4078_v21, %v2718_v5  ;;  %v2716_v0 = vadd.f32 %v2613_v6, %v2504_v1  ;;  %v2511_v21 = vadd.f32 %v5650_v59, %v2086_v55  ;;  %v6377_v5 = vld [vmem:[#allocation21_spill] sm:$0xff]  ;;  %v6378_v6 = vld [vmem:[#allocation12_spill] sm:$0xff] }
 0x1d5   : > { %v2963_v26 = vadd.f32 %v2962_v7, %v2961_v8  ;;  %v4045_v15 = vpop.f32.mrf.mxu1  ;;  %v2828_v2 = vpop.f32.mrf.mxu0 }
 0x1d6   : > { %3615 = vst.msk [vmem:[%s5734_s9 + $0x91] sm:$0xff] %vm2952_vm8, %v5815_v44  ;;  %v5825_v34 = vadd.f32 %v2825_v18, %v2716_v0  ;;  %v2719_v30 = vadd.f32 %v4045_v15, %v2507_v11  ;;  %v2972_v39 = vsel %vm2952_vm8, %v5815_v44, 0.0  ;;  %v2090_v11 = vadd.f32 %v6377_v5, %v5557_v9  ;;  %v6379_v0 = vld [vmem:[#allocation11_spill] sm:$0xff] }
 0x1d7   : > { %v2965_v49 = vadd.f32 %v2964_v19, %v2963_v26  ;;  %v2616_v50 = vpop.f32.mrf.mxu1  ;;  %v4082_v17 = vpop.f32.mrf.mxu0  ;;  %v2512_v52 = vadd.f32 %v6379_v0, %v2087_v14 }
 0x1d8   : > { %3613 = vst.msk [vmem:[%s5734_s9 + $0x79] sm:$0xff] %vm2952_vm8, %v5825_v34  ;;  %v5835_v43 = vadd.f32 %v4079_v31, %v2719_v30  ;;  %v2717_v13 = vadd.f32 %v2616_v50, %v2505_v37  ;;  %v2968_v60 = vsel %vm2952_vm8, %v5825_v34, 0.0  ;;  %v2514_v31 = vadd.f32 %v6378_v6, %v2089_v36  ;;  %v6381_v37 = vld [vmem:[#allocation23_spill] sm:$0xff]  ;;  %v6382_v50 = vld [vmem:[#allocation13_spill] sm:$0xff] }
 0x1d9   : > { %v2967_v16 = vadd.f32 %v2966_v57, %v2965_v49  ;;  %v4048_v10 = vpop.f32.mrf.mxu1  ;;  %v2841_v63 = vpop.f32.mrf.mxu0 }
 0x1da   : > { %3616 = vst.msk [vmem:[%s5734_s9 + $0x99] sm:$0xff] %vm2952_vm8, %v5835_v43  ;;  %v5845_v4 = vadd.f32 %v2828_v2, %v2717_v13  ;;  %v2722_v41 = vadd.f32 %v4048_v10, %v2510_v51  ;;  %v2974_v47 = vsel %vm2952_vm8, %v5835_v43, 0.0  ;;  %v6380_v2 = vld [vmem:[#allocation14_spill] sm:$0xff] }
 0x1db   : > { %v2969_v23 = vadd.f32 %v2968_v60, %v2967_v16  ;;  %v2629_v25 = vpop.f32.mrf.mxu1  ;;  %v4083_v24 = vpop.f32.mrf.mxu0  ;;  %v2088_v19 = vadd.f32 %v6381_v37, %v6380_v2  ;;  %v6384_v16 = vld [vmem:[#allocation25_spill] sm:$0xff] }
 0x1dc   : > { %v2970_v33 = vsel %vm2952_vm8, %v5845_v4, 0.0  ;;  %3614 = vst.msk [vmem:[%s5734_s9 + $0x81] sm:$0xff] %vm2952_vm8, %v5845_v4  ;;  %v5855_v40 = vadd.f32 %v4082_v17, %v2722_v41  ;;  %v2720_v1 = vadd.f32 %v2629_v25, %v2508_v28  ;;  %v2515_v17 = vadd.f32 %v6382_v50, %v2090_v11  ;;  %v6383_v28 = vld [vmem:[#allocation15_spill] sm:$0xff]  ;;  %v6385_v41 = vld [vmem:[#allocation16_spill] sm:$0xff] }
 0x1dd   : > { %v2971_v59 = vadd.f32 %v2970_v33, %v2969_v23  ;;  %v4049_v12 = vpop.f32.mrf.mxu1  ;;  %v2844_v18 = vpop.f32.mrf.mxu0  ;;  %v2093_v10 = vadd.f32 %v6384_v16, %v6383_v28  ;;  %v6387_v33 = vld [vmem:[#allocation22_spill] sm:$0xff]  ;;  %v6396_v28 = vld [vmem:[#allocation33_spill] sm:$0xff] }
 0x1de   : > { %3619 = vst.msk [vmem:[%s5734_s9 + $0xc1] sm:$0xff] %vm2952_vm8, %v5855_v40  ;;  %v5865_v45 = vadd.f32 %v2841_v63, %v2720_v1  ;;  %v2723_v53 = vadd.f32 %v4049_v12, %v2511_v21  ;;  %v6386_v21 = vld [vmem:[#allocation27_spill] sm:$0xff]  ;;  %v2513_v1 = vadd.f32 %v6387_v33, %v2088_v19  ;;  %v2980_v14 = vsel %vm2952_vm8, %v5855_v40, 0.0  ;;  %v6399_v33 = vld [vmem:[#allocation30_spill] sm:$0xff] }
 0x1df   : > { %v2973_v8 = vadd.f32 %v2972_v39, %v2971_v59  ;;  %v2632_v27 = vpop.f32.mrf.mxu1  ;;  %v4086_v48 = vpop.f32.mrf.mxu0  ;;  %v2091_v23 = vadd.f32 %v6386_v21, %v6385_v41  ;;  %v6397_v41 = vld [vmem:[#allocation19_spill] sm:$0xff] }
 0x1e0   : > { %3617 = vst.msk [vmem:[%s5734_s9 + $0xa9] sm:$0xff] %vm2952_vm8, %v5865_v45  ;;  %v5875_v61 = vadd.f32 %v4083_v24, %v2723_v53  ;;  %v2721_v7 = vadd.f32 %v2632_v27, %v2509_v29  ;;  %v2976_v30 = vsel %vm2952_vm8, %v5865_v45, 0.0  ;;  %v6389_v29 = vld [vmem:[#allocation29_spill] sm:$0xff]  ;;  %v6398_v21 = vld [vmem:[#allocation35_spill] sm:$0xff] }
 0x1e1   : > { %v2975_v26 = vadd.f32 %v2974_v47, %v2973_v8  ;;  %v4052_v15 = vpop.f32.mrf.mxu1  ;;  %v2857_v9 = vpop.f32.mrf.mxu0  ;;  %v6390_v8 = vld [vmem:[#allocation24_spill] sm:$0xff]  ;;  %v6391_v47 = vld [vmem:[#allocation26_spill] sm:$0xff] }
 0x1e2   : > { %3620 = vst.msk [vmem:[%s5734_s9 + $0xc9] sm:$0xff] %vm2952_vm8, %v5875_v61  ;;  %v5885_v55 = vadd.f32 %v2844_v18, %v2721_v7  ;;  %v2726_v49 = vadd.f32 %v4052_v15, %v2514_v31  ;;  %v6388_v18 = vld [vmem:[#allocation6_spill] sm:$0xff]  ;;  %v2518_v27 = vadd.f32 %v6390_v8, %v2093_v10  ;;  %v2516_v7 = vadd.f32 %v6391_v47, %v2091_v23  ;;  %v6392_v15 = vld [vmem:[#allocation5_spill] sm:$0xff] }
 0x1e3   : > { %v2977_v51 = vadd.f32 %v2976_v30, %v2975_v26  ;;  %v2645_v57 = vpop.f32.mrf.mxu1  ;;  %v4087_v13 = vpop.f32.mrf.mxu0  ;;  %v2094_v39 = vadd.f32 %v6389_v29, %v6388_v18  ;;  %v2095_v23 = vadd.f32 %v6398_v21, %v6397_v41  ;;  %v6400_v29 = vld [vmem:[#allocation8_spill] sm:$0xff] }
 0x1e4   : > { %v2978_v63 = vsel %vm2952_vm8, %v5885_v55, 0.0  ;;  %3618 = vst.msk [vmem:[%s5734_s9 + $0xb1] sm:$0xff] %vm2952_vm8, %v5885_v55  ;;  %v5895_v22 = vadd.f32 %v4086_v48, %v2726_v49  ;;  %v2724_v60 = vadd.f32 %v2645_v57, %v2512_v52  ;;  %v2982_v48 = vsel %vm2952_vm8, %v5875_v61, 0.0  ;;  %v6394_v49 = vld [vmem:[#allocation28_spill] sm:$0xff] }
 0x1e5   : > { %v2979_v25 = vadd.f32 %v2978_v63, %v2977_v51  ;;  %v4053_v24 = vpop.f32.mrf.mxu1  ;;  %v2860_v36 = vpop.f32.mrf.mxu0  ;;  %v2519_v50 = vadd.f32 %v6394_v49, %v2094_v39  ;;  %v6401_v39 = vld [vmem:[#allocation37_spill] sm:$0xff] }
 0x1e6   : > { %3623 = vst.msk [vmem:[%s5734_s9 + $0xf1] sm:$0xff] %vm2952_vm8, %v5895_v22  ;;  %v5905_v59 = vadd.f32 %v2857_v9, %v2724_v60  ;;  %v2727_v12 = vadd.f32 %v4053_v24, %v2515_v17  ;;  %v6393_v9 = vld [vmem:[#allocation31_spill] sm:$0xff] }
 0x1e7   : > { %v2981_v53 = vadd.f32 %v2980_v14, %v2979_v25  ;;  %v2648_v5 = vpop.f32.mrf.mxu1  ;;  %v4090_v11 = vpop.f32.mrf.mxu0  ;;  %v2092_v2 = vadd.f32 %v6393_v9, %v6392_v15  ;;  %v2988_v14 = vsel %vm2952_vm8, %v5895_v22, 0.0 }
 0x1e8   : > { %3621 = vst.msk [vmem:[%s5734_s9 + $0xd9] sm:$0xff] %vm2952_vm8, %v5905_v59  ;;  %v5915_v6 = vadd.f32 %v4087_v13, %v2727_v12  ;;  %v2725_v31 = vadd.f32 %v2648_v5, %v2513_v1  ;;  %v2984_v37 = vsel %vm2952_vm8, %v5905_v59, 0.0  ;;  %v6395_v13 = vld [vmem:[#allocation17_spill] sm:$0xff] }
 0x1e9   : > { %v2983_v0 = vadd.f32 %v2982_v48, %v2981_v53  ;;  %v4056_v52 = vpop.f32.mrf.mxu1  ;;  %v2873_v26 = vpop.f32.mrf.mxu0  ;;  %v2097_v16 = vadd.f32 %v6396_v28, %v6395_v13  ;;  %v2517_v1 = vadd.f32 %v6399_v33, %v2092_v2  ;;  %v2098_v53 = vadd.f32 %v6401_v39, %v6400_v29  ;;  %v6404_v2 = vld [vmem:[#allocation10_spill] sm:$0xff]  ;;  %v6407_v13 = vld [vmem:[#allocation7_spill] sm:$0xff]  ;;  %v6408_v28 = vld [vmem:[#allocation41_spill] sm:$0xff] }
 0x1ea   : > { %3624 = vst.msk [vmem:[%s5734_s9 + $0xf9] sm:$0xff] %vm2952_vm8, %v5915_v6  ;;  %v5925_v19 = vadd.f32 %v2860_v36, %v2725_v31  ;;  %v2730_v30 = vadd.f32 %v4056_v52, %v2518_v27  ;;  %v6402_v27 = vld [vmem:[#allocation32_spill] sm:$0xff]  ;;  %v2990_v31 = vsel %vm2952_vm8, %v5915_v6, 0.0  ;;  %v6411_v29 = vld [vmem:[#allocation38_spill] sm:$0xff] }
 0x1eb   : > { %v2985_v17 = vadd.f32 %v2984_v37, %v2983_v0  ;;  %v2661_v51 = vpop.f32.mrf.mxu1  ;;  %v4091_v57 = vpop.f32.mrf.mxu0  ;;  %v2522_v48 = vadd.f32 %v6402_v27, %v2097_v16  ;;  %v6403_v0 = vld [vmem:[#allocation34_spill] sm:$0xff]  ;;  %v6405_v37 = vld [vmem:[#allocation39_spill] sm:$0xff]  ;;  %v2101_v16 = vadd.f32 %v6408_v28, %v6407_v13  ;;  %v6412_v27 = vld [vmem:[#allocation40_spill] sm:$0xff] }
 0x1ec   : > { %v2986_v10 = vsel %vm2952_vm8, %v5925_v19, 0.0  ;;  %3622 = vst.msk [vmem:[%s5734_s9 + $0xe1] sm:$0xff] %vm2952_vm8, %v5925_v19  ;;  %v5935_v63 = vadd.f32 %v4090_v11, %v2730_v30  ;;  %v2728_v60 = vadd.f32 %v2661_v51, %v2516_v7  ;;  %v2520_v52 = vadd.f32 %v6403_v0, %v2095_v23  ;;  %v6406_v51 = vld [vmem:[#allocation36_spill] sm:$0xff] }
 0x1ed   : > { %v2987_v25 = vadd.f32 %v2986_v10, %v2985_v17  ;;  %v4057_v24 = vpop.f32.mrf.mxu1  ;;  %v2876_v36 = vpop.f32.mrf.mxu0  ;;  %v2096_v30 = vadd.f32 %v6405_v37, %v6404_v2  ;;  %v6414_v37 = vld [vmem:[#allocation42_spill] sm:$0xff] }
 0x1ee   : > { %3627 = vst.msk [vmem:[%s5734_s9 + $0x121] sm:$0xff] %vm2952_vm8, %v5935_v63  ;;  %v5945_v12 = vadd.f32 %v2873_v26, %v2728_v60  ;;  %v2731_v18 = vadd.f32 %v4057_v24, %v2519_v50  ;;  %v6409_v24 = vld [vmem:[#allocation20_spill] sm:$0xff] }
 0x1ef   : > { %v2989_v5 = vadd.f32 %v2988_v14, %v2987_v25  ;;  %v2664_v11 = vpop.f32.mrf.mxu1  ;;  %v4094_v8 = vpop.f32.mrf.mxu0  ;;  %v2521_v39 = vadd.f32 %v6411_v29, %v2096_v30 }
 0x1f0   : > { %3625 = vst.msk [vmem:[%s5734_s9 + $0x109] sm:$0xff] %vm2952_vm8, %v5945_v12  ;;  %v5955_v47 = vadd.f32 %v4091_v57, %v2731_v18  ;;  %v2729_v7 = vadd.f32 %v2664_v11, %v2517_v1  ;;  %v2992_v49 = vsel %vm2952_vm8, %v5945_v12, 0.0  ;;  %v2523_v57 = vadd.f32 %v6406_v51, %v2098_v53 }
 0x1f1   : > { %v2991_v26 = vadd.f32 %v2990_v31, %v2989_v5  ;;  %v4060_v15 = vpop.f32.mrf.mxu1  ;;  %v2889_v9 = vpop.f32.mrf.mxu0  ;;  %v2996_v53 = vsel %vm2952_vm8, %v5935_v63, 0.0 }
 0x1f2   : > { %3628 = vst.msk [vmem:[%s5734_s9 + $0x129] sm:$0xff] %vm2952_vm8, %v5955_v47  ;;  %v5965_v50 = vadd.f32 %v2876_v36, %v2729_v7  ;;  %v2734_v17 = vadd.f32 %v4060_v15, %v2522_v48  ;;  %v6410_v36 = vld [vmem:[#allocation43_spill] sm:$0xff]  ;;  %v2526_v48 = vadd.f32 %v6412_v27, %v2101_v16  ;;  %v2998_v15 = vsel %vm2952_vm8, %v5955_v47, 0.0 }
 0x1f3   : > { %v2993_v10 = vadd.f32 %v2992_v49, %v2991_v26  ;;  %v2677_v60 = vpop.f32.mrf.mxu1  ;;  %v4095_v41 = vpop.f32.mrf.mxu0  ;;  %v2099_v33 = vadd.f32 %v6410_v36, %v6409_v24 }
 0x1f4   : > { %v2994_v21 = vsel %vm2952_vm8, %v5965_v50, 0.0  ;;  %3626 = vst.msk [vmem:[%s5734_s9 + $0x111] sm:$0xff] %vm2952_vm8, %v5965_v50  ;;  %v5975_v23 = vadd.f32 %v4094_v8, %v2734_v17  ;;  %v2732_v25 = vadd.f32 %v2677_v60, %v2520_v52  ;;  %v4248_v8 = vmov 0.0   ;;  %v6413_v52 = vld [vmem:[#allocation9_spill] sm:$0xff] }
 0x1f5   : > { %v2995_v1 = vadd.f32 %v2994_v21, %v2993_v10  ;;  %v4061_v14 = vpop.f32.mrf.mxu1  ;;  %v2892_v18 = vpop.f32.mrf.mxu0  ;;  %3160 = vst.msk [vmem:[%s5734_s9] sm:$0xff] %vm2952_vm8, %v4248_v8  ;;  %3161 = vst.msk [vmem:[%s5734_s9 + $0x8] sm:$0xff] %vm2952_vm8, %v4248_v8  ;;  %v2102_v26 = vadd.f32 %v5717_v58, %v6413_v52  ;;  %v2524_v30 = vadd.f32 %v6414_v37, %v2099_v33 }
 0x1f6   : > { %3631 = vst.msk [vmem:[%s5734_s9 + $0x151] sm:$0xff] %vm2952_vm8, %v5975_v23  ;;  %v5985_v5 = vadd.f32 %v2889_v9, %v2732_v25  ;;  %v2735_v11 = vadd.f32 %v4061_v14, %v2523_v57  ;;  %3570 = vst.msk [vmem:[%s5734_s9 + $0x198] sm:$0xff] %vm2952_vm8, %v4248_v8  ;;  %v6415_v57 = vld [vmem:[#allocation18_spill] sm:$0xff] }
 0x1f7   : > { %3162 = vst.msk [vmem:[%s5734_s9 + $0x10] sm:$0x3] %vm3158_vm9, %v4248_v8  ;;  %3572 = vst.msk [vmem:[%s5734_s9 + $0x1a8] sm:$0x3] %vm3158_vm9, %v4248_v8  ;;  %v2997_v31 = vadd.f32 %v2996_v53, %v2995_v1  ;;  %v2680_v7 = vpop.f32.mrf.mxu1  ;;  %v4098_v0 = vpop.f32.mrf.mxu0  ;;  %v2100_v13 = vadd.f32 %v5723_v38, %v6415_v57 }
 0x1f8   : > { %3571 = vst.msk [vmem:[%s5734_s9 + $0x1a0] sm:$0xff] %vm2952_vm8, %v4248_v8  ;;  %3629 = vst.msk [vmem:[%s5734_s9 + $0x139] sm:$0xff] %vm2952_vm8, %v5985_v5  ;;  %v6071_v9 = vadd.f32 %v4095_v41, %v2735_v11  ;;  %v2733_v2 = vadd.f32 %v2680_v7, %v2521_v39  ;;  %v3000_v58 = vsel %vm2952_vm8, %v5985_v5, 0.0  ;;  %v6416_v41 = vld [vmem:[#allocation44_spill] sm:$0xff] }
 0x1f9   : > { %3573 = vst.msk [vmem:[%s5734_s9 + $0x18] sm:$0x1] %vm3168_vm10, %v4248_v8  ;;  %3574 = vst.msk [vmem:[%s5734_s9 + $0x30] sm:$0x1] %vm3168_vm10, %v4248_v8  ;;  %v2999_v49 = vadd.f32 %v2998_v15, %v2997_v31  ;;  %v4064_v17 = vpop.f32.mrf.mxu1  ;;  %v2905_v51 = vpop.f32.mrf.mxu0  ;;  %v2527_v21 = vadd.f32 %v6416_v41, %v2102_v26  ;;  %v2525_v14 = vadd.f32 %v5719_v32, %v2100_v13 }
 0x1fa   : > { %3575 = vst.msk [vmem:[%s5734_s9 + $0x48] sm:$0x1] %vm3168_vm10, %v4248_v8  ;;  %3576 = vst.msk [vmem:[%s5734_s9 + $0x60] sm:$0x1] %vm3168_vm10, %v4248_v8  ;;  %v6081_v28 = vadd.f32 %v2892_v18, %v2733_v2  ;;  %v2738_v16 = vadd.f32 %v4064_v17, %v2526_v48  ;;  %v3004_v18 = vsel %vm2952_vm8, %v5975_v23, 0.0 }
 0x1fb   : > { %3577 = vst.msk [vmem:[%s5734_s9 + $0x78] sm:$0x1] %vm3168_vm10, %v4248_v8  ;;  %3578 = vst.msk [vmem:[%s5734_s9 + $0x90] sm:$0x1] %vm3168_vm10, %v4248_v8  ;;  %v3001_v10 = vadd.f32 %v3000_v58, %v2999_v49  ;;  %v2693_v60 = vpop.f32.mrf.mxu1  ;;  %v4099_v1 = vpop.f32.mrf.mxu0 }
 0x1fc   : > { %3579 = vst.msk [vmem:[%s5734_s9 + $0xa8] sm:$0x1] %vm3168_vm10, %v4248_v8  ;;  %3580 = vst.msk [vmem:[%s5734_s9 + $0xc0] sm:$0x1] %vm3168_vm10, %v4248_v8  ;;  %v3002_v25 = vsel %vm2952_vm8, %v6081_v28, 0.0  ;;  %v6089_v38 = vadd.f32 %v4098_v0, %v2738_v16  ;;  %v2736_v24 = vadd.f32 %v2693_v60, %v2524_v30 }
 0x1fd   : > { %3581 = vst.msk [vmem:[%s5734_s9 + $0xd8] sm:$0x1] %vm3168_vm10, %v4248_v8  ;;  %3582 = vst.msk [vmem:[%s5734_s9 + $0xf0] sm:$0x1] %vm3168_vm10, %v4248_v8  ;;  %v3003_v36 = vadd.f32 %v3002_v25, %v3001_v10  ;;  %v4065_v33 = vpop.f32.mrf.mxu1  ;;  %v2908_v31 = vpop.f32.mrf.mxu0 }
 0x1fe   : > { %3583 = vst.msk [vmem:[%s5734_s9 + $0x108] sm:$0x1] %vm3168_vm10, %v4248_v8  ;;  %3584 = vst.msk [vmem:[%s5734_s9 + $0x120] sm:$0x1] %vm3168_vm10, %v4248_v8  ;;  %v6097_v29 = vadd.f32 %v2905_v51, %v2736_v24  ;;  %v2739_v39 = vadd.f32 %v4065_v33, %v2527_v21  ;;  %v3012_v2 = vsel %vm2952_vm8, %v6089_v38, 0.0 }
 0x1ff   : > { %3585 = vst.msk [vmem:[%s5734_s9 + $0x138] sm:$0x1] %vm3168_vm10, %v4248_v8  ;;  %3586 = vst.msk [vmem:[%s5734_s9 + $0x150] sm:$0x1] %vm3168_vm10, %v4248_v8  ;;  %v3005_v53 = vadd.f32 %v3004_v18, %v3003_v36  ;;  %v2696_v11 = vpop.f32.mrf.mxu1 }
 0x200   : > { %3587 = vst.msk [vmem:[%s5734_s9 + $0x168] sm:$0x1] %vm3168_vm10, %v4248_v8  ;;  %3588 = vst.msk [vmem:[%s5734_s9 + $0x180] sm:$0x1] %vm3168_vm10, %v4248_v8  ;;  %v6104_v27 = vadd.f32 %v4099_v1, %v2739_v39  ;;  %v2737_v32 = vadd.f32 %v2696_v11, %v2525_v14  ;;  %v3008_v7 = vsel %vm2952_vm8, %v6097_v29, 0.0 }
 0x201   : > { %3589 = vst.msk [vmem:[%s5734_s9 + $0x29] sm:$0x1] %vm3168_vm10, %v4248_v8  ;;  %3590 = vst.msk [vmem:[%s5734_s9 + $0x41] sm:$0x1] %vm3168_vm10, %v4248_v8 }
 0x202   : > { %3591 = vst.msk [vmem:[%s5734_s9 + $0x59] sm:$0x1] %vm3168_vm10, %v4248_v8  ;;  %3592 = vst.msk [vmem:[%s5734_s9 + $0x71] sm:$0x1] %vm3168_vm10, %v4248_v8  ;;  %v6111_v0 = vadd.f32 %v2908_v31, %v2737_v32  ;;  %v3014_v30 = vsel %vm2952_vm8, %v6104_v27, 0.0 }
 0x203   : > { %3593 = vst.msk [vmem:[%s5734_s9 + $0x89] sm:$0x1] %vm3168_vm10, %v4248_v8  ;;  %3594 = vst.msk [vmem:[%s5734_s9 + $0xa1] sm:$0x1] %vm3168_vm10, %v4248_v8 }
 0x204   : > { %3595 = vst.msk [vmem:[%s5734_s9 + $0xb9] sm:$0x1] %vm3168_vm10, %v4248_v8  ;;  %3596 = vst.msk [vmem:[%s5734_s9 + $0xd1] sm:$0x1] %vm3168_vm10, %v4248_v8  ;;  %v3010_v26 = vsel %vm2952_vm8, %v6111_v0, 0.0 }
 0x205   : > { %3597 = vst.msk [vmem:[%s5734_s9 + $0xe9] sm:$0x1] %vm3168_vm10, %v4248_v8  ;;  %3598 = vst.msk [vmem:[%s5734_s9 + $0x101] sm:$0x1] %vm3168_vm10, %v4248_v8 }
 0x206   : > { %3599 = vst.msk [vmem:[%s5734_s9 + $0x119] sm:$0x1] %vm3168_vm10, %v4248_v8  ;;  %3600 = vst.msk [vmem:[%s5734_s9 + $0x131] sm:$0x1] %vm3168_vm10, %v4248_v8 }
 0x207   : > { %3601 = vst.msk [vmem:[%s5734_s9 + $0x149] sm:$0x1] %vm3168_vm10, %v4248_v8  ;;  %3602 = vst.msk [vmem:[%s5734_s9 + $0x161] sm:$0x1] %vm3168_vm10, %v4248_v8 }
 0x208   : > { %3603 = vst.msk [vmem:[%s5734_s9 + $0x179] sm:$0x1] %vm3168_vm10, %v4248_v8  ;;  %3604 = vst.msk [vmem:[%s5734_s9 + $0x191] sm:$0x1] %vm3168_vm10, %v4248_v8  ;;  %v3006_v8 = vsel %vm2952_vm8, %v6071_v9, 0.0 }
 0x209   : > { %3632 = vst.msk [vmem:[%s5734_s9 + $0x159] sm:$0xff] %vm2952_vm8, %v6071_v9  ;;  %3630 = vst.msk [vmem:[%s5734_s9 + $0x141] sm:$0xff] %vm2952_vm8, %v6081_v28  ;;  %v3007_v48 = vadd.f32 %v3006_v8, %v3005_v53 }
 0x20a   : > { %3635 = vst.msk [vmem:[%s5734_s9 + $0x181] sm:$0xff] %vm2952_vm8, %v6089_v38  ;;  %3633 = vst.msk [vmem:[%s5734_s9 + $0x169] sm:$0xff] %vm2952_vm8, %v6097_v29 }
 0x20b   : > { %3636 = vst.msk [vmem:[%s5734_s9 + $0x189] sm:$0xff] %vm2952_vm8, %v6104_v27  ;;  %v3009_v52 = vadd.f32 %v3008_v7, %v3007_v48  ;;  %3634 = vst.msk [vmem:[%s5734_s9 + $0x171] sm:$0xff] %vm2952_vm8, %v6111_v0 }
 0x20d   : > { %v3011_v15 = vadd.f32 %v3010_v26, %v3009_v52 }
 0x20f   : > { %v3013_v37 = vadd.f32 %v3012_v2, %v3011_v15 }
 0x211   : > { %v3015_v49 = vadd.f32 %v3014_v30, %v3013_v37 }
 0x213   : > { %v3016_v17 = vrot.slane %v3015_v49, 4 }
 0x215   : > { %v3017_v51 = vadd.f32 %v3016_v17, %v3015_v49 }
 0x217   : > { %v3018_v57 = vrot.slane %v3017_v51, 2 }
 0x219   : > { %v3019_v13 = vadd.f32 %v3018_v57, %v3017_v51 }
 0x21b   : > { %v3020_v58 = vrot.slane %v3019_v13, 1 }
 0x21d   : > { %v3021_v16 = vadd.f32 %v3020_v58, %v3019_v13 }
 0x21f   : > { %v6122_v10 = vmul.f32 0.00390625, %v3021_v16 }
 0x221   : > { %v3023_v60 = vsub.f32 %v5747_v56, %v6122_v10  ;;  %v3024_v41 = vsub.f32 %v5763_v42, %v6122_v10  ;;  %v3025_v21 = vsub.f32 %v5739_v35, %v6122_v10  ;;  %v3026_v25 = vsub.f32 %v5755_v46, %v6122_v10 }
 0x222   : > { %v3027_v33 = vsub.f32 %v5785_v62, %v6122_v10  ;;  %v3028_v14 = vsub.f32 %v5805_v3, %v6122_v10  ;;  %v3029_v35 = vsub.f32 %v5775_v20, %v6122_v10  ;;  %v3030_v62 = vsub.f32 %v5795_v54, %v6122_v10 }
 0x223   : > { %v3055_v24 = vmul.f32 %v3023_v60, %v3023_v60  ;;  %v3056_v36 = vmul.f32 %v3024_v41, %v3024_v41  ;;  %v3057_v1 = vmul.f32 %v3025_v21, %v3025_v21  ;;  %v3058_v18 = vmul.f32 %v3026_v25, %v3026_v25 }
 0x224   : > { %v3059_v53 = vmul.f32 %v3027_v33, %v3027_v33  ;;  %v3060_v8 = vmul.f32 %v3028_v14, %v3028_v14  ;;  %v3031_v48 = vsub.f32 %v5825_v34, %v6122_v10  ;;  %v3061_v31 = vmul.f32 %v3029_v35, %v3029_v35 }
 0x225   : > { %v3087_v56 = vsel %vm2952_vm8, %v3055_v24, 0.0  ;;  %v3088_v42 = vsel %vm2952_vm8, %v3056_v36, 0.0  ;;  %v3090_v46 = vsel %vm2952_vm8, %v3057_v1, 0.0  ;;  %v3092_v32 = vsel %vm2952_vm8, %v3058_v18, 0.0 }
 0x226   : > { %v3089_v39 = vadd.f32 %v3088_v42, %v3087_v56  ;;  %v3094_v7 = vsel %vm2952_vm8, %v3059_v53, 0.0  ;;  %v3032_v20 = vsub.f32 %v5845_v4, %v6122_v10  ;;  %v3062_v26 = vmul.f32 %v3030_v62, %v3030_v62 }
 0x227   : > { %v3096_v15 = vsel %vm2952_vm8, %v3060_v8, 0.0  ;;  %v3033_v54 = vsub.f32 %v5815_v44, %v6122_v10  ;;  %v3063_v37 = vmul.f32 %v3031_v48, %v3031_v48  ;;  %v3098_v30 = vsel %vm2952_vm8, %v3061_v31, 0.0 }
 0x228   : > { %v3091_v11 = vadd.f32 %v3090_v46, %v3089_v39  ;;  %v3034_v34 = vsub.f32 %v5835_v43, %v6122_v10  ;;  %v3064_v17 = vmul.f32 %v3032_v20, %v3032_v20  ;;  %v3100_v51 = vsel %vm2952_vm8, %v3062_v26, 0.0 }
 0x229   : > { %v3035_v4 = vsub.f32 %v5865_v45, %v6122_v10  ;;  %v3065_v13 = vmul.f32 %v3033_v54, %v3033_v54  ;;  %v3102_v58 = vsel %vm2952_vm8, %v3063_v37, 0.0  ;;  %v3036_v44 = vsub.f32 %v5885_v55, %v6122_v10 }
 0x22a   : > { %v3093_v3 = vadd.f32 %v3092_v32, %v3091_v11  ;;  %v3066_v60 = vmul.f32 %v3034_v34, %v3034_v34  ;;  %v3104_v41 = vsel %vm2952_vm8, %v3064_v17, 0.0  ;;  %v3037_v43 = vsub.f32 %v5855_v40, %v6122_v10 }
 0x22b   : > { %v3067_v25 = vmul.f32 %v3035_v4, %v3035_v4  ;;  %v3106_v24 = vsel %vm2952_vm8, %v3065_v13, 0.0  ;;  %v3038_v45 = vsub.f32 %v5875_v61, %v6122_v10  ;;  %v3068_v33 = vmul.f32 %v3036_v44, %v3036_v44 }
 0x22c   : > { %v3095_v52 = vadd.f32 %v3094_v7, %v3093_v3  ;;  %v3108_v1 = vsel %vm2952_vm8, %v3066_v60, 0.0  ;;  %v3039_v55 = vsub.f32 %v5905_v59, %v6122_v10  ;;  %v3069_v18 = vmul.f32 %v3037_v43, %v3037_v43 }
 0x22d   : > { %v3110_v56 = vsel %vm2952_vm8, %v3067_v25, 0.0  ;;  %v3040_v40 = vsub.f32 %v5925_v19, %v6122_v10  ;;  %v3070_v39 = vmul.f32 %v3038_v45, %v3038_v45  ;;  %v3112_v35 = vsel %vm2952_vm8, %v3068_v33, 0.0 }
 0x22e   : > { %v3097_v2 = vadd.f32 %v3096_v15, %v3095_v52  ;;  %v3041_v61 = vsub.f32 %v5895_v22, %v6122_v10  ;;  %v3071_v46 = vmul.f32 %v3039_v55, %v3039_v55  ;;  %v3114_v11 = vsel %vm2952_vm8, %v3069_v18, 0.0 }
 0x22f   : > { %v3042_v59 = vsub.f32 %v5915_v6, %v6122_v10  ;;  %v3072_v8 = vmul.f32 %v3040_v40, %v3040_v40  ;;  %v3116_v32 = vsel %vm2952_vm8, %v3070_v39, 0.0  ;;  %v3043_v19 = vsub.f32 %v5945_v12, %v6122_v10 }
 0x230   : > { %v3099_v49 = vadd.f32 %v3098_v30, %v3097_v2  ;;  %v3073_v48 = vmul.f32 %v3041_v61, %v3041_v61  ;;  %v3118_v31 = vsel %vm2952_vm8, %v3071_v46, 0.0  ;;  %v3044_v22 = vsub.f32 %v5965_v50, %v6122_v10 }
 0x231   : > { %v3074_v52 = vmul.f32 %v3042_v59, %v3042_v59  ;;  %v3120_v20 = vsel %vm2952_vm8, %v3072_v8, 0.0  ;;  %v3045_v6 = vsub.f32 %v5935_v63, %v6122_v10  ;;  %v3075_v15 = vmul.f32 %v3043_v19, %v3043_v19 }
 0x232   : > { %v3101_v57 = vadd.f32 %v3100_v51, %v3099_v49  ;;  %v3122_v2 = vsel %vm2952_vm8, %v3073_v48, 0.0  ;;  %v3046_v12 = vsub.f32 %v5955_v47, %v6122_v10  ;;  %v3076_v37 = vmul.f32 %v3044_v22, %v3044_v22 }
 0x233   : > { %v3124_v30 = vsel %vm2952_vm8, %v3074_v52, 0.0  ;;  %v3047_v50 = vsub.f32 %v5985_v5, %v6122_v10  ;;  %v3077_v34 = vmul.f32 %v3045_v6, %v3045_v6  ;;  %v3126_v17 = vsel %vm2952_vm8, %v3075_v15, 0.0 }
 0x234   : > { %v3103_v16 = vadd.f32 %v3102_v58, %v3101_v57  ;;  %v3048_v63 = vsub.f32 %v6081_v28, %v6122_v10  ;;  %v3078_v57 = vmul.f32 %v3046_v12, %v3046_v12  ;;  %v3128_v4 = vsel %vm2952_vm8, %v3076_v37, 0.0 }
 0x235   : > { %v3049_v47 = vsub.f32 %v5975_v23, %v6122_v10  ;;  %v3079_v58 = vmul.f32 %v3047_v50, %v3047_v50  ;;  %v3050_v5 = vsub.f32 %v6071_v9, %v6122_v10  ;;  %v3051_v28 = vsub.f32 %v6097_v29, %v6122_v10 }
 0x236   : > { %v3105_v21 = vadd.f32 %v3104_v41, %v3103_v16  ;;  %v3130_v16 = vsel %vm2952_vm8, %v3077_v34, 0.0  ;;  %v3080_v60 = vmul.f32 %v3048_v63, %v3048_v63  ;;  %v3132_v41 = vsel %vm2952_vm8, %v3078_v57, 0.0 }
 0x237   : > { %v3081_v43 = vmul.f32 %v3049_v47, %v3049_v47  ;;  %v3134_v25 = vsel %vm2952_vm8, %v3079_v58, 0.0  ;;  %v3052_v23 = vsub.f32 %v6111_v0, %v6122_v10  ;;  %v3053_v9 = vsub.f32 %v6089_v38, %v6122_v10 }
 0x238   : > { %v3107_v36 = vadd.f32 %v3106_v24, %v3105_v21  ;;  %v3136_v45 = vsel %vm2952_vm8, %v3080_v60, 0.0  ;;  %v3054_v29 = vsub.f32 %v6104_v27, %v6122_v10 }
 0x239   : > { %v3084_v18 = vmul.f32 %v3052_v23, %v3052_v23  ;;  %v3085_v0 = vmul.f32 %v3053_v9, %v3053_v9 }
 0x23a   : > { %v3109_v14 = vadd.f32 %v3108_v1, %v3107_v36  ;;  %v3082_v36 = vmul.f32 %v3050_v5, %v3050_v5  ;;  %v3083_v1 = vmul.f32 %v3051_v28, %v3051_v28 }
 0x23b   : > { %v3144_v38 = vsel %vm2952_vm8, %v3084_v18, 0.0  ;;  %v3146_v61 = vsel %vm2952_vm8, %v3085_v0, 0.0 }
 0x23c   : > { %v3111_v42 = vadd.f32 %v3110_v56, %v3109_v14  ;;  %v3138_v14 = vsel %vm2952_vm8, %v3081_v43, 0.0  ;;  %v3140_v56 = vsel %vm2952_vm8, %v3082_v36, 0.0  ;;  %v3142_v40 = vsel %vm2952_vm8, %v3083_v1, 0.0 }
 0x23e   : > { %v3113_v53 = vadd.f32 %v3112_v35, %v3111_v42  ;;  %v3086_v35 = vmul.f32 %v3054_v29, %v3054_v29 }
 0x240   : > { %v3115_v62 = vadd.f32 %v3114_v11, %v3113_v53  ;;  %v3148_v11 = vsel %vm2952_vm8, %v3086_v35, 0.0 }
 0x242   : > { %v3117_v3 = vadd.f32 %v3116_v32, %v3115_v62 }
 0x244   : > { %v3119_v7 = vadd.f32 %v3118_v31, %v3117_v3 }
 0x246   : > { %v3121_v26 = vadd.f32 %v3120_v20, %v3119_v7 }
 0x248   : > { %v3123_v54 = vadd.f32 %v3122_v2, %v3121_v26 }
 0x24a   : > { %v3125_v49 = vadd.f32 %v3124_v30, %v3123_v54 }
 0x24c   : > { %v3127_v51 = vadd.f32 %v3126_v17, %v3125_v49 }
 0x24e   : > { %v3129_v13 = vadd.f32 %v3128_v4, %v3127_v51 }
 0x250   : > { %v3131_v44 = vadd.f32 %v3130_v16, %v3129_v13 }
 0x252   : > { %v3133_v21 = vadd.f32 %v3132_v41, %v3131_v44 }
 0x254   : > { %v3135_v24 = vadd.f32 %v3134_v25, %v3133_v21 }
 0x256   : > { %v3137_v33 = vadd.f32 %v3136_v45, %v3135_v24 }
 0x258   : > { %v3139_v55 = vadd.f32 %v3138_v14, %v3137_v33 }
 0x25a   : > { %v3141_v42 = vadd.f32 %v3140_v56, %v3139_v55 }
 0x25c   : > { %v3143_v39 = vadd.f32 %v3142_v40, %v3141_v42 }
 0x25e   : > { %v3145_v53 = vadd.f32 %v3144_v38, %v3143_v39 }
 0x260   : > { %v3147_v46 = vadd.f32 %v3146_v61, %v3145_v53 }
 0x262   : > { %v3149_v62 = vadd.f32 %v3148_v11, %v3147_v46 }
 0x264   : > { %v3150_v27 = vrot.slane %v3149_v62, 4 }
 0x266   : > { %v3151_v59 = vadd.f32 %v3150_v27, %v3149_v62 }
 0x268   : > { %v3152_v8 = vrot.slane %v3151_v59, 2 }
 0x26a   : > { %v3153_v32 = vadd.f32 %v3152_v8, %v3151_v59 }
 0x26c   : > { %v3154_v3 = vrot.slane %v3153_v32, 1 }
 0x26e   : > { %v3155_v19 = vadd.f32 %v3154_v3, %v3153_v32 }
 0x270   : > { %v3157_v48 = vsel %vm3156_vm11, %v6122_v10, %v3155_v19 }
 0x271   : > { %3159 = vst.msk [vmem:[%s225_s15] sm:$0x3] %vm3158_vm9, %v3157_v48 }
 0x272   : > { %4199 = shalt.err (!%p4196_p3)
}
 0x273   : > { %s4200_s6 = scalar_lea.hbm %s6225_s23, 32  ;;  %s4204_s10 = scalar_lea.hbm %s6267_s5, 64 }
 0x274   : > { %p4201_p4 = scmp.ne.s32.totalorder %s6225_s23, %s4200_s6  ;;  %p4205_p9 = scmp.lt.s32.totalorder %s6225_s23, %s6267_s5 }
 0x275   : > { %p4206_p10 = scmp.lt.s32.totalorder %s4204_s10, %s4200_s6 }
 0x276   : > { %p4202_p7 = pnand %p4201_p4, %p4318_p5 }
 0x277   : > { %p4207_p11 = por %p4206_p10, %p4205_p9 }
 0x278   : > { %p4203_p8 = pneg %p4202_p7 }
 0x27a   : > { %p4208_p12 = pnand %p4207_p11, %p4203_p8 }
 0x27c   : > { %4211 = shalt.err (!%p4208_p12)
}
 0x27d   : > { %4114 = dma.vmem_to_hbm [thread:$0]  (%p4318_p5), %s3256_s16, 32, %s6225_s23, %s3239_s24  }
 0x27e PF: > { %p4120_p13 = scmp.ge.s32.totalorder %s4246_s21, 2  ;;  %s3275_s12 = sand.u32 1, %s4234_s18  }
 0x27f   : > { %s3276_s13 = scalar_lea.sflag [#allocation3], %s3275_s12 }
 0x280   : > { %p4117_p0 = pnand %p4120_p13, %p4322_p6 }
 0x282   : > { %p4118_p1 = pneg %p4117_p0 }
 0x284   : > { %4229 = dma.done.wait (%p4118_p1), %s3276_s13, 32  }
 0x285   : > { %4231 = vsyncadd (%p4118_p1), %s3276_s13, 4294967264  ;;  %p16_p2 = scmp.ge.s32.totalorder %s4305_s22, 4   ;;  %s6417_s18 = smov %s4238_s19 }
 0x286   : > { %s6418_s19 = smov %s4242_s20  ;;  %s6419_s20 = smov %s4316_s25 }
 0x287   : > { %s6420_s21 = smov %s4305_s22  ;;  %18 = sbr.rel (!%p16_p2) target bundleno = 3 (0x3), region = 93 }
 0x28c   :  { %3281 = vsyncpa [#allocation3], 1 }
 0x28d   :  { %3283 = vsyncpa [#allocation3 + $0x1], 1 }

</bundles_post_ra>
